<compile_context>
chip_gen: v7x
topology: tpu7x:2x2x1
jax: 0.10.0
libtpu: 0.0.40
codegen_flags: <defaults>
</compile_context>

<pallas_src>
import functools

import jax
import jax.numpy as jnp
from jax.experimental import pallas as pl
from jax.experimental.pallas import tpu as pltpu


def basic_block_kernel(x_ref, w1_ref, b1_ref, w2_ref, b2_ref, out_ref, *,
                       dilation, prev_dilation, Ho, Wo, He, We, Cin, P):
    """One batch element.

    x_ref : (1, Hp, Wp*Cin)  zero-padded input, lane-flattened (w, c)
    w1_ref: (9, We*Cin, We*P) block-diagonal per-tap conv1 weights (BN1 scale folded)
    b1_ref: (1, We*P)         BN1 bias, tiled across W
    w2_ref: (9, Wo*P, Wo*P)   block-diagonal per-tap conv2 weights (BN2 scale folded)
    b2_ref: (1, Wo*P)         BN2 bias, tiled across W
    out_ref: (1, Ho, Wo*P)
    """
    d1, p2 = dilation, prev_dilation
    x = x_ref[0]                                   # (Hp, Wp*Cin), f32

    # ---- conv1 (+ folded BN1 scale) over the extended (He, We) region ----
    y = jnp.zeros((He, We * P), jnp.float32)
    tap = 0
    for kh in range(3):
        for kw in range(3):
            xs = x[kh * d1: kh * d1 + He,
                   kw * d1 * Cin: kw * d1 * Cin + We * Cin]     # (He, We*Cin)
            y = y + jnp.dot(xs, w1_ref[tap],
                            preferred_element_type=jnp.float32)
            tap += 1

    # bn1 bias + relu
    y = jnp.maximum(y + b1_ref[...], 0.0)

    # Zero the p2-wide halo: it then plays the role of conv2's zero padding.
    ri = jax.lax.broadcasted_iota(jnp.int32, (He, We * P), 0)
    ci = jax.lax.broadcasted_iota(jnp.int32, (He, We * P), 1)
    interior = ((ri >= p2) & (ri < p2 + Ho) &
                (ci >= p2 * P) & (ci < (p2 + Wo) * P))
    y = jnp.where(interior, y, 0.0)

    # ---- conv2 (+ folded BN2 scale) over the (Ho, Wo) region ----
    z = jnp.zeros((Ho, Wo * P), jnp.float32)
    tap = 0
    for kh in range(3):
        for kw in range(3):
            ys = y[kh * p2: kh * p2 + Ho,
                   kw * p2 * P: kw * p2 * P + Wo * P]           # (Ho, Wo*P)
            z = z + jnp.dot(ys, w2_ref[tap],
                            preferred_element_type=jnp.float32)
            tap += 1
    z = z + b2_ref[...]

    # ---- identity residual (sliced from the padded input) + relu ----
    pt = d1 + p2
    res = x[pt: pt + Ho, pt * Cin: (pt + Wo) * Cin]             # (Ho, Wo*P)
    out_ref[0] = jnp.maximum(z + res, 0.0).astype(out_ref.dtype)


def _block_diag_weights(w, width):
    """w: (3, 3, Cin, Cout) -> (9, width*Cin, width*Cout).

    B[t, w*Cin+ci, v*Cout+co] = (w == v) * W[t, ci, co]
    so a lane-flattened (rows, width*Cin) activation times B gives the per-tap
    conv contribution directly in (rows, width*Cout) layout.
    """
    _, _, cin, cout = w.shape
    taps = w.reshape(9, cin, cout)
    eye = jnp.eye(width, dtype=w.dtype)
    bd = jnp.einsum('wv,tio->twivo', eye, taps)
    return bd.reshape(9, width * cin, width * cout)


def basic_block_forward(x_nhwc, w1, s1, b1, w2, s2, b2, *,
                        stride=1, dilation=1, previous_dilation=1):
    """x_nhwc: (N, H, W, Cin) f32. w*: (3,3,Cin,P) HWIO. s*/b* folded BN (per-channel)."""
    N, H, W, Cin = x_nhwc.shape
    P = w1.shape[-1]
    assert stride == 1 and Cin == P, "identity residual needs stride=1, Cin==planes"
    # TODO(synk): downsample path not implemented (module default downsample=None).

    d1, p2 = dilation, previous_dilation
    Ho, Wo = H, W                       # stride-1 'same' convolutions
    He, We = Ho + 2 * p2, Wo + 2 * p2   # conv1 extended output region
    pt = d1 + p2
    Hp, Wp = H + 2 * pt, W + 2 * pt

    # Fold BN scale into the conv weights (only bias + relu stay in-kernel).
    w1s = (w1 * s1.reshape(1, 1, 1, P)).astype(jnp.float32)
    w2s = (w2 * s2.reshape(1, 1, 1, P)).astype(jnp.float32)

    w1_bd = _block_diag_weights(w1s, We)             # (9, We*Cin, We*P)
    w2_bd = _block_diag_weights(w2s, Wo)             # (9, Wo*P,  Wo*P)
    b1_flat = jnp.tile(b1.reshape(P), (We,)).reshape(1, We * P).astype(jnp.float32)
    b2_flat = jnp.tile(b2.reshape(P), (Wo,)).reshape(1, Wo * P).astype(jnp.float32)

    xpad = jnp.pad(x_nhwc.astype(jnp.float32),
                   ((0, 0), (pt, pt), (pt, pt), (0, 0)))
    xflat = xpad.reshape(N, Hp, Wp * Cin)            # lane-flattened (w, c)

    kernel = functools.partial(basic_block_kernel,
                               dilation=d1, prev_dilation=p2,
                               Ho=Ho, Wo=Wo, He=He, We=We, Cin=Cin, P=P)

    out_flat = pl.pallas_call(
        kernel,
        out_shape=jax.ShapeDtypeStruct((N, Ho, Wo * P), x_nhwc.dtype),
        grid=(N,),
        in_specs=[
            pl.BlockSpec((1, Hp, Wp * Cin), lambda n: (n, 0, 0)),
            pl.BlockSpec((9, We * Cin, We * P), lambda n: (0, 0, 0)),
            pl.BlockSpec((1, We * P), lambda n: (0, 0)),
            pl.BlockSpec((9, Wo * P, Wo * P), lambda n: (0, 0, 0)),
            pl.BlockSpec((1, Wo * P), lambda n: (0, 0)),
        ],
        out_specs=pl.BlockSpec((1, Ho, Wo * P), lambda n: (n, 0, 0)),
        compiler_params=pltpu.CompilerParams(
            dimension_semantics=("parallel",)),
    )(xflat, w1_bd, b1_flat, w2_bd, b2_flat)

    return out_flat.reshape(N, Ho, Wo, P)


def _fold_bn(gamma, beta, mean, var, eps=1e-5):
    scale = gamma / jnp.sqrt(var + eps)
    bias = beta - mean * scale
    return scale.reshape(1, -1), bias.reshape(1, -1)


def _conv_ref(x, w, stride, dilation):
    return jax.lax.conv_general_dilated(
        x, w, window_strides=(stride, stride),
        padding=[(dilation, dilation), (dilation, dilation)],
        rhs_dilation=(dilation, dilation),
        dimension_numbers=("NHWC", "HWIO", "NHWC"))


if __name__ == "__main__":
    # Module config: BasicBlock(inplanes=8, planes=8, stride=1, dilation=1,
    #                           previous_dilation=1, downsample=None)
    N, H, W = 2, 16, 16
    inplanes = planes = 8
    stride, dilation, previous_dilation = 1, 1, 1

    key = jax.random.PRNGKey(0)
    ks = jax.random.split(key, 11)

    # Input (PyTorch NCHW) -> NHWC
    x_nchw = jax.random.normal(ks[0], (N, inplanes, H, W), jnp.float32)
    x_nhwc = jnp.transpose(x_nchw, (0, 2, 3, 1))

    # Conv weights (deterministic init), HWIO layout
    w1 = 0.1 * jax.random.normal(ks[1], (3, 3, inplanes, planes), jnp.float32)
    w2 = 0.1 * jax.random.normal(ks[2], (3, 3, planes, planes), jnp.float32)

    # BatchNorm parameters (inference mode), folded into scale/bias
    g1 = 1.0 + 0.1 * jax.random.normal(ks[3], (planes,), jnp.float32)
    be1 = 0.1 * jax.random.normal(ks[4], (planes,), jnp.float32)
    m1 = 0.1 * jax.random.normal(ks[5], (planes,), jnp.float32)
    v1 = 1.0 + 0.1 * jax.random.uniform(ks[6], (planes,), jnp.float32)
    g2 = 1.0 + 0.1 * jax.random.normal(ks[7], (planes,), jnp.float32)
    be2 = 0.1 * jax.random.normal(ks[8], (planes,), jnp.float32)
    m2 = 0.1 * jax.random.normal(ks[9], (planes,), jnp.float32)
    v2 = 1.0 + 0.1 * jax.random.uniform(ks[10], (planes,), jnp.float32)

    s1, b1 = _fold_bn(g1, be1, m1, v1)
    s2, b2 = _fold_bn(g2, be2, m2, v2)

    out = basic_block_forward(x_nhwc, w1, s1, b1, w2, s2, b2,
                              stride=stride, dilation=dilation,
                              previous_dilation=previous_dilation)
    out = jax.block_until_ready(out)

    # Pure-JAX reference of the same forward pass.
    r = _conv_ref(x_nhwc, w1, stride, dilation)
    r = jnp.maximum(r * s1 + b1, 0.0)
    r = _conv_ref(r, w2, 1, previous_dilation)
    r = r * s2 + b2 + x_nhwc
    r = jnp.maximum(r, 0.0)

    assert out.shape == (N, H, W, planes)
    assert jnp.allclose(out, r, atol=2e-4, rtol=2e-4), \
        f"max err {jnp.max(jnp.abs(out - r))}"

    print("KERNEL_OK")
</pallas_src>

<mosaic_0001>
module attributes {stable_mosaic.version = 11 : i64} {
  func.func @basic_block_kernel(%arg0: i32, %arg1: memref<1x20x160xf32, #tpu.memory_space<vmem>>, %arg2: memref<9x144x144xf32, #tpu.memory_space<vmem>>, %arg3: memref<1x144xf32, #tpu.memory_space<vmem>>, %arg4: memref<9x128x128xf32, #tpu.memory_space<vmem>>, %arg5: memref<1x128xf32, #tpu.memory_space<vmem>>, %arg6: memref<1x16x128xf32, #tpu.memory_space<vmem>>) attributes {dimension_semantics = [#tpu.dimension_semantics<parallel>], iteration_bounds = array<i64: 2>, scalar_prefetch = 0 : i64, scratch_operands = 0 : i64, tpu.core_type = #tpu.core_type<tc>, window_params = [{transform_indices = @transform_0, window_bounds = array<i64: 1, 20, 160>}, {pipeline_mode = #tpu.pipeline_mode<synchronous>, transform_indices = @transform_1, window_bounds = array<i64: 9, 144, 144>}, {pipeline_mode = #tpu.pipeline_mode<synchronous>, transform_indices = @transform_2, window_bounds = array<i64: 1, 144>}, {pipeline_mode = #tpu.pipeline_mode<synchronous>, transform_indices = @transform_3, window_bounds = array<i64: 9, 128, 128>}, {pipeline_mode = #tpu.pipeline_mode<synchronous>, transform_indices = @transform_4, window_bounds = array<i64: 1, 128>}, {transform_indices = @transform_5, window_bounds = array<i64: 1, 16, 128>}]} {
    %c0 = arith.constant 0 : index
    %c0_0 = arith.constant 0 : index
    %c0_1 = arith.constant 0 : index
    %0 = vector.load %arg1[%c0, %c0_0, %c0_1] : memref<1x20x160xf32, #tpu.memory_space<vmem>>, vector<1x20x160xf32>
    %1 = vector.shape_cast %0 : vector<1x20x160xf32> to vector<20x160xf32>
    %cst = arith.constant 0.000000e+00 : f32
    %2 = vector.broadcast %cst : f32 to vector<18x144xf32>
    %3 = vector.extract_strided_slice %1 {offsets = [0, 0], sizes = [18, 144], strides = [1, 1]} : vector<20x160xf32> to vector<18x144xf32>
    %c0_2 = arith.constant 0 : index
    %c0_3 = arith.constant 0 : index
    %c0_4 = arith.constant 0 : index
    %4 = vector.load %arg2[%c0_2, %c0_3, %c0_4] : memref<9x144x144xf32, #tpu.memory_space<vmem>>, vector<1x144x144xf32>
    %5 = vector.shape_cast %4 : vector<1x144x144xf32> to vector<144x144xf32>
    %cst_5 = arith.constant dense<0.000000e+00> : vector<18x144xf32>
    %6 = tpu.matmul %3, %5, %cst_5 {dimension_numbers = #tpu.dot_dimension_numbers<[1], [0], [0], [1], [0, 0, 1, 1], [], []>} : vector<18x144xf32>, vector<144x144xf32>, vector<18x144xf32> -> vector<18x144xf32>
    %7 = arith.addf %2, %6 : vector<18x144xf32>
    %8 = vector.extract_strided_slice %1 {offsets = [0, 8], sizes = [18, 144], strides = [1, 1]} : vector<20x160xf32> to vector<18x144xf32>
    %c1 = arith.constant 1 : index
    %c0_6 = arith.constant 0 : index
    %c0_7 = arith.constant 0 : index
    %9 = vector.load %arg2[%c1, %c0_6, %c0_7] : memref<9x144x144xf32, #tpu.memory_space<vmem>>, vector<1x144x144xf32>
    %10 = vector.shape_cast %9 : vector<1x144x144xf32> to vector<144x144xf32>
    %cst_8 = arith.constant dense<0.000000e+00> : vector<18x144xf32>
    %11 = tpu.matmul %8, %10, %cst_8 {dimension_numbers = #tpu.dot_dimension_numbers<[1], [0], [0], [1], [0, 0, 1, 1], [], []>} : vector<18x144xf32>, vector<144x144xf32>, vector<18x144xf32> -> vector<18x144xf32>
    %12 = arith.addf %7, %11 : vector<18x144xf32>
    %13 = vector.extract_strided_slice %1 {offsets = [0, 16], sizes = [18, 144], strides = [1, 1]} : vector<20x160xf32> to vector<18x144xf32>
    %c2 = arith.constant 2 : index
    %c0_9 = arith.constant 0 : index
    %c0_10 = arith.constant 0 : index
    %14 = vector.load %arg2[%c2, %c0_9, %c0_10] : memref<9x144x144xf32, #tpu.memory_space<vmem>>, vector<1x144x144xf32>
    %15 = vector.shape_cast %14 : vector<1x144x144xf32> to vector<144x144xf32>
    %cst_11 = arith.constant dense<0.000000e+00> : vector<18x144xf32>
    %16 = tpu.matmul %13, %15, %cst_11 {dimension_numbers = #tpu.dot_dimension_numbers<[1], [0], [0], [1], [0, 0, 1, 1], [], []>} : vector<18x144xf32>, vector<144x144xf32>, vector<18x144xf32> -> vector<18x144xf32>
    %17 = arith.addf %12, %16 : vector<18x144xf32>
    %18 = vector.extract_strided_slice %1 {offsets = [1, 0], sizes = [18, 144], strides = [1, 1]} : vector<20x160xf32> to vector<18x144xf32>
    %c3 = arith.constant 3 : index
    %c0_12 = arith.constant 0 : index
    %c0_13 = arith.constant 0 : index
    %19 = vector.load %arg2[%c3, %c0_12, %c0_13] : memref<9x144x144xf32, #tpu.memory_space<vmem>>, vector<1x144x144xf32>
    %20 = vector.shape_cast %19 : vector<1x144x144xf32> to vector<144x144xf32>
    %cst_14 = arith.constant dense<0.000000e+00> : vector<18x144xf32>
    %21 = tpu.matmul %18, %20, %cst_14 {dimension_numbers = #tpu.dot_dimension_numbers<[1], [0], [0], [1], [0, 0, 1, 1], [], []>} : vector<18x144xf32>, vector<144x144xf32>, vector<18x144xf32> -> vector<18x144xf32>
    %22 = arith.addf %17, %21 : vector<18x144xf32>
    %23 = vector.extract_strided_slice %1 {offsets = [1, 8], sizes = [18, 144], strides = [1, 1]} : vector<20x160xf32> to vector<18x144xf32>
    %c4 = arith.constant 4 : index
    %c0_15 = arith.constant 0 : index
    %c0_16 = arith.constant 0 : index
    %24 = vector.load %arg2[%c4, %c0_15, %c0_16] : memref<9x144x144xf32, #tpu.memory_space<vmem>>, vector<1x144x144xf32>
    %25 = vector.shape_cast %24 : vector<1x144x144xf32> to vector<144x144xf32>
    %cst_17 = arith.constant dense<0.000000e+00> : vector<18x144xf32>
    %26 = tpu.matmul %23, %25, %cst_17 {dimension_numbers = #tpu.dot_dimension_numbers<[1], [0], [0], [1], [0, 0, 1, 1], [], []>} : vector<18x144xf32>, vector<144x144xf32>, vector<18x144xf32> -> vector<18x144xf32>
    %27 = arith.addf %22, %26 : vector<18x144xf32>
    %28 = vector.extract_strided_slice %1 {offsets = [1, 16], sizes = [18, 144], strides = [1, 1]} : vector<20x160xf32> to vector<18x144xf32>
    %c5 = arith.constant 5 : index
    %c0_18 = arith.constant 0 : index
    %c0_19 = arith.constant 0 : index
    %29 = vector.load %arg2[%c5, %c0_18, %c0_19] : memref<9x144x144xf32, #tpu.memory_space<vmem>>, vector<1x144x144xf32>
    %30 = vector.shape_cast %29 : vector<1x144x144xf32> to vector<144x144xf32>
    %cst_20 = arith.constant dense<0.000000e+00> : vector<18x144xf32>
    %31 = tpu.matmul %28, %30, %cst_20 {dimension_numbers = #tpu.dot_dimension_numbers<[1], [0], [0], [1], [0, 0, 1, 1], [], []>} : vector<18x144xf32>, vector<144x144xf32>, vector<18x144xf32> -> vector<18x144xf32>
    %32 = arith.addf %27, %31 : vector<18x144xf32>
    %33 = vector.extract_strided_slice %1 {offsets = [2, 0], sizes = [18, 144], strides = [1, 1]} : vector<20x160xf32> to vector<18x144xf32>
    %c6 = arith.constant 6 : index
    %c0_21 = arith.constant 0 : index
    %c0_22 = arith.constant 0 : index
    %34 = vector.load %arg2[%c6, %c0_21, %c0_22] : memref<9x144x144xf32, #tpu.memory_space<vmem>>, vector<1x144x144xf32>
    %35 = vector.shape_cast %34 : vector<1x144x144xf32> to vector<144x144xf32>
    %cst_23 = arith.constant dense<0.000000e+00> : vector<18x144xf32>
    %36 = tpu.matmul %33, %35, %cst_23 {dimension_numbers = #tpu.dot_dimension_numbers<[1], [0], [0], [1], [0, 0, 1, 1], [], []>} : vector<18x144xf32>, vector<144x144xf32>, vector<18x144xf32> -> vector<18x144xf32>
    %37 = arith.addf %32, %36 : vector<18x144xf32>
    %38 = vector.extract_strided_slice %1 {offsets = [2, 8], sizes = [18, 144], strides = [1, 1]} : vector<20x160xf32> to vector<18x144xf32>
    %c7 = arith.constant 7 : index
    %c0_24 = arith.constant 0 : index
    %c0_25 = arith.constant 0 : index
    %39 = vector.load %arg2[%c7, %c0_24, %c0_25] : memref<9x144x144xf32, #tpu.memory_space<vmem>>, vector<1x144x144xf32>
    %40 = vector.shape_cast %39 : vector<1x144x144xf32> to vector<144x144xf32>
    %cst_26 = arith.constant dense<0.000000e+00> : vector<18x144xf32>
    %41 = tpu.matmul %38, %40, %cst_26 {dimension_numbers = #tpu.dot_dimension_numbers<[1], [0], [0], [1], [0, 0, 1, 1], [], []>} : vector<18x144xf32>, vector<144x144xf32>, vector<18x144xf32> -> vector<18x144xf32>
    %42 = arith.addf %37, %41 : vector<18x144xf32>
    %43 = vector.extract_strided_slice %1 {offsets = [2, 16], sizes = [18, 144], strides = [1, 1]} : vector<20x160xf32> to vector<18x144xf32>
    %c8 = arith.constant 8 : index
    %c0_27 = arith.constant 0 : index
    %c0_28 = arith.constant 0 : index
    %44 = vector.load %arg2[%c8, %c0_27, %c0_28] : memref<9x144x144xf32, #tpu.memory_space<vmem>>, vector<1x144x144xf32>
    %45 = vector.shape_cast %44 : vector<1x144x144xf32> to vector<144x144xf32>
    %cst_29 = arith.constant dense<0.000000e+00> : vector<18x144xf32>
    %46 = tpu.matmul %43, %45, %cst_29 {dimension_numbers = #tpu.dot_dimension_numbers<[1], [0], [0], [1], [0, 0, 1, 1], [], []>} : vector<18x144xf32>, vector<144x144xf32>, vector<18x144xf32> -> vector<18x144xf32>
    %47 = arith.addf %42, %46 : vector<18x144xf32>
    %c0_30 = arith.constant 0 : index
    %c0_31 = arith.constant 0 : index
    %48 = vector.load %arg3[%c0_30, %c0_31] : memref<1x144xf32, #tpu.memory_space<vmem>>, vector<1x144xf32>
    %49 = vector.broadcast %48 : vector<1x144xf32> to vector<18x144xf32>
    %50 = arith.addf %47, %49 : vector<18x144xf32>
    %cst_32 = arith.constant 0.000000e+00 : f32
    %51 = vector.broadcast %cst_32 : f32 to vector<18x144xf32>
    %52 = arith.maximumf %50, %51 : vector<18x144xf32>
    %53 = tpu.iota {dimensions = array<i32: 0>} : vector<18x144xi32>
    %54 = tpu.iota {dimensions = array<i32: 1>} : vector<18x144xi32>
    %c1_i32 = arith.constant 1 : i32
    %55 = vector.broadcast %c1_i32 : i32 to vector<18x144xi32>
    %56 = arith.cmpi sge, %53, %55 : vector<18x144xi32>
    %c17_i32 = arith.constant 17 : i32
    %57 = vector.broadcast %c17_i32 : i32 to vector<18x144xi32>
    %58 = arith.cmpi slt, %53, %57 : vector<18x144xi32>
    %59 = arith.andi %56, %58 : vector<18x144xi1>
    %c8_i32 = arith.constant 8 : i32
    %60 = vector.broadcast %c8_i32 : i32 to vector<18x144xi32>
    %61 = arith.cmpi sge, %54, %60 : vector<18x144xi32>
    %62 = arith.andi %59, %61 : vector<18x144xi1>
    %c136_i32 = arith.constant 136 : i32
    %63 = vector.broadcast %c136_i32 : i32 to vector<18x144xi32>
    %64 = arith.cmpi slt, %54, %63 : vector<18x144xi32>
    %65 = arith.andi %62, %64 : vector<18x144xi1>
    %cst_33 = arith.constant 0.000000e+00 : f32
    %66 = vector.broadcast %cst_33 : f32 to vector<18x144xf32>
    %67 = arith.select %65, %52, %66 : vector<18x144xi1>, vector<18x144xf32>
    %cst_34 = arith.constant 0.000000e+00 : f32
    %68 = vector.broadcast %cst_34 : f32 to vector<16x128xf32>
    %69 = vector.extract_strided_slice %67 {offsets = [0, 0], sizes = [16, 128], strides = [1, 1]} : vector<18x144xf32> to vector<16x128xf32>
    %c0_35 = arith.constant 0 : index
    %c0_36 = arith.constant 0 : index
    %c0_37 = arith.constant 0 : index
    %70 = vector.load %arg4[%c0_35, %c0_36, %c0_37] : memref<9x128x128xf32, #tpu.memory_space<vmem>>, vector<1x128x128xf32>
    %71 = vector.shape_cast %70 : vector<1x128x128xf32> to vector<128x128xf32>
    %cst_38 = arith.constant dense<0.000000e+00> : vector<16x128xf32>
    %72 = tpu.matmul %69, %71, %cst_38 {dimension_numbers = #tpu.dot_dimension_numbers<[1], [0], [0], [1], [0, 0, 1, 1], [], []>} : vector<16x128xf32>, vector<128x128xf32>, vector<16x128xf32> -> vector<16x128xf32>
    %73 = arith.addf %68, %72 : vector<16x128xf32>
    %74 = vector.extract_strided_slice %67 {offsets = [0, 8], sizes = [16, 128], strides = [1, 1]} : vector<18x144xf32> to vector<16x128xf32>
    %c1_39 = arith.constant 1 : index
    %c0_40 = arith.constant 0 : index
    %c0_41 = arith.constant 0 : index
    %75 = vector.load %arg4[%c1_39, %c0_40, %c0_41] : memref<9x128x128xf32, #tpu.memory_space<vmem>>, vector<1x128x128xf32>
    %76 = vector.shape_cast %75 : vector<1x128x128xf32> to vector<128x128xf32>
    %cst_42 = arith.constant dense<0.000000e+00> : vector<16x128xf32>
    %77 = tpu.matmul %74, %76, %cst_42 {dimension_numbers = #tpu.dot_dimension_numbers<[1], [0], [0], [1], [0, 0, 1, 1], [], []>} : vector<16x128xf32>, vector<128x128xf32>, vector<16x128xf32> -> vector<16x128xf32>
    %78 = arith.addf %73, %77 : vector<16x128xf32>
    %79 = vector.extract_strided_slice %67 {offsets = [0, 16], sizes = [16, 128], strides = [1, 1]} : vector<18x144xf32> to vector<16x128xf32>
    %c2_43 = arith.constant 2 : index
    %c0_44 = arith.constant 0 : index
    %c0_45 = arith.constant 0 : index
    %80 = vector.load %arg4[%c2_43, %c0_44, %c0_45] : memref<9x128x128xf32, #tpu.memory_space<vmem>>, vector<1x128x128xf32>
    %81 = vector.shape_cast %80 : vector<1x128x128xf32> to vector<128x128xf32>
    %cst_46 = arith.constant dense<0.000000e+00> : vector<16x128xf32>
    %82 = tpu.matmul %79, %81, %cst_46 {dimension_numbers = #tpu.dot_dimension_numbers<[1], [0], [0], [1], [0, 0, 1, 1], [], []>} : vector<16x128xf32>, vector<128x128xf32>, vector<16x128xf32> -> vector<16x128xf32>
    %83 = arith.addf %78, %82 : vector<16x128xf32>
    %84 = vector.extract_strided_slice %67 {offsets = [1, 0], sizes = [16, 128], strides = [1, 1]} : vector<18x144xf32> to vector<16x128xf32>
    %c3_47 = arith.constant 3 : index
    %c0_48 = arith.constant 0 : index
    %c0_49 = arith.constant 0 : index
    %85 = vector.load %arg4[%c3_47, %c0_48, %c0_49] : memref<9x128x128xf32, #tpu.memory_space<vmem>>, vector<1x128x128xf32>
    %86 = vector.shape_cast %85 : vector<1x128x128xf32> to vector<128x128xf32>
    %cst_50 = arith.constant dense<0.000000e+00> : vector<16x128xf32>
    %87 = tpu.matmul %84, %86, %cst_50 {dimension_numbers = #tpu.dot_dimension_numbers<[1], [0], [0], [1], [0, 0, 1, 1], [], []>} : vector<16x128xf32>, vector<128x128xf32>, vector<16x128xf32> -> vector<16x128xf32>
    %88 = arith.addf %83, %87 : vector<16x128xf32>
    %89 = vector.extract_strided_slice %67 {offsets = [1, 8], sizes = [16, 128], strides = [1, 1]} : vector<18x144xf32> to vector<16x128xf32>
    %c4_51 = arith.constant 4 : index
    %c0_52 = arith.constant 0 : index
    %c0_53 = arith.constant 0 : index
    %90 = vector.load %arg4[%c4_51, %c0_52, %c0_53] : memref<9x128x128xf32, #tpu.memory_space<vmem>>, vector<1x128x128xf32>
    %91 = vector.shape_cast %90 : vector<1x128x128xf32> to vector<128x128xf32>
    %cst_54 = arith.constant dense<0.000000e+00> : vector<16x128xf32>
    %92 = tpu.matmul %89, %91, %cst_54 {dimension_numbers = #tpu.dot_dimension_numbers<[1], [0], [0], [1], [0, 0, 1, 1], [], []>} : vector<16x128xf32>, vector<128x128xf32>, vector<16x128xf32> -> vector<16x128xf32>
    %93 = arith.addf %88, %92 : vector<16x128xf32>
    %94 = vector.extract_strided_slice %67 {offsets = [1, 16], sizes = [16, 128], strides = [1, 1]} : vector<18x144xf32> to vector<16x128xf32>
    %c5_55 = arith.constant 5 : index
    %c0_56 = arith.constant 0 : index
    %c0_57 = arith.constant 0 : index
    %95 = vector.load %arg4[%c5_55, %c0_56, %c0_57] : memref<9x128x128xf32, #tpu.memory_space<vmem>>, vector<1x128x128xf32>
    %96 = vector.shape_cast %95 : vector<1x128x128xf32> to vector<128x128xf32>
    %cst_58 = arith.constant dense<0.000000e+00> : vector<16x128xf32>
    %97 = tpu.matmul %94, %96, %cst_58 {dimension_numbers = #tpu.dot_dimension_numbers<[1], [0], [0], [1], [0, 0, 1, 1], [], []>} : vector<16x128xf32>, vector<128x128xf32>, vector<16x128xf32> -> vector<16x128xf32>
    %98 = arith.addf %93, %97 : vector<16x128xf32>
    %99 = vector.extract_strided_slice %67 {offsets = [2, 0], sizes = [16, 128], strides = [1, 1]} : vector<18x144xf32> to vector<16x128xf32>
    %c6_59 = arith.constant 6 : index
    %c0_60 = arith.constant 0 : index
    %c0_61 = arith.constant 0 : index
    %100 = vector.load %arg4[%c6_59, %c0_60, %c0_61] : memref<9x128x128xf32, #tpu.memory_space<vmem>>, vector<1x128x128xf32>
    %101 = vector.shape_cast %100 : vector<1x128x128xf32> to vector<128x128xf32>
    %cst_62 = arith.constant dense<0.000000e+00> : vector<16x128xf32>
    %102 = tpu.matmul %99, %101, %cst_62 {dimension_numbers = #tpu.dot_dimension_numbers<[1], [0], [0], [1], [0, 0, 1, 1], [], []>} : vector<16x128xf32>, vector<128x128xf32>, vector<16x128xf32> -> vector<16x128xf32>
    %103 = arith.addf %98, %102 : vector<16x128xf32>
    %104 = vector.extract_strided_slice %67 {offsets = [2, 8], sizes = [16, 128], strides = [1, 1]} : vector<18x144xf32> to vector<16x128xf32>
    %c7_63 = arith.constant 7 : index
    %c0_64 = arith.constant 0 : index
    %c0_65 = arith.constant 0 : index
    %105 = vector.load %arg4[%c7_63, %c0_64, %c0_65] : memref<9x128x128xf32, #tpu.memory_space<vmem>>, vector<1x128x128xf32>
    %106 = vector.shape_cast %105 : vector<1x128x128xf32> to vector<128x128xf32>
    %cst_66 = arith.constant dense<0.000000e+00> : vector<16x128xf32>
    %107 = tpu.matmul %104, %106, %cst_66 {dimension_numbers = #tpu.dot_dimension_numbers<[1], [0], [0], [1], [0, 0, 1, 1], [], []>} : vector<16x128xf32>, vector<128x128xf32>, vector<16x128xf32> -> vector<16x128xf32>
    %108 = arith.addf %103, %107 : vector<16x128xf32>
    %109 = vector.extract_strided_slice %67 {offsets = [2, 16], sizes = [16, 128], strides = [1, 1]} : vector<18x144xf32> to vector<16x128xf32>
    %c8_67 = arith.constant 8 : index
    %c0_68 = arith.constant 0 : index
    %c0_69 = arith.constant 0 : index
    %110 = vector.load %arg4[%c8_67, %c0_68, %c0_69] : memref<9x128x128xf32, #tpu.memory_space<vmem>>, vector<1x128x128xf32>
    %111 = vector.shape_cast %110 : vector<1x128x128xf32> to vector<128x128xf32>
    %cst_70 = arith.constant dense<0.000000e+00> : vector<16x128xf32>
    %112 = tpu.matmul %109, %111, %cst_70 {dimension_numbers = #tpu.dot_dimension_numbers<[1], [0], [0], [1], [0, 0, 1, 1], [], []>} : vector<16x128xf32>, vector<128x128xf32>, vector<16x128xf32> -> vector<16x128xf32>
    %113 = arith.addf %108, %112 : vector<16x128xf32>
    %c0_71 = arith.constant 0 : index
    %c0_72 = arith.constant 0 : index
    %114 = vector.load %arg5[%c0_71, %c0_72] : memref<1x128xf32, #tpu.memory_space<vmem>>, vector<1x128xf32>
    %115 = vector.broadcast %114 : vector<1x128xf32> to vector<16x128xf32>
    %116 = arith.addf %113, %115 : vector<16x128xf32>
    %117 = vector.extract_strided_slice %1 {offsets = [2, 16], sizes = [16, 128], strides = [1, 1]} : vector<20x160xf32> to vector<16x128xf32>
    %118 = arith.addf %116, %117 : vector<16x128xf32>
    %cst_73 = arith.constant 0.000000e+00 : f32
    %119 = vector.broadcast %cst_73 : f32 to vector<16x128xf32>
    %120 = arith.maximumf %118, %119 : vector<16x128xf32>
    %c0_74 = arith.constant 0 : index
    %c0_75 = arith.constant 0 : index
    %c0_76 = arith.constant 0 : index
    %121 = vector.load %arg6[%c0_74, %c0_75, %c0_76] : memref<1x16x128xf32, #tpu.memory_space<vmem>>, vector<1x16x128xf32>
    %122 = vector.shape_cast %121 : vector<1x16x128xf32> to vector<16x128xf32>
    %123 = vector.shape_cast %120 : vector<16x128xf32> to vector<1x16x128xf32>
    tpu.vector_store %arg6[%c0_74, %c0_75, %c0_76], %123 {strides = array<i32>} : memref<1x16x128xf32, #tpu.memory_space<vmem>>, vector<1x16x128xf32>,
    return
  }
  func.func @transform_0(%arg0: i32) -> (i32, i32, i32) {
    %c0_i32 = arith.constant 0 : i32
    %c0_i32_0 = arith.constant 0 : i32
    %c0_i32_1 = arith.constant 0 : i32
    return %arg0, %c0_i32, %c0_i32_0 : i32, i32, i32
  }
  func.func @transform_1(%arg0: i32) -> (i32, i32, i32) {
    %c0_i32 = arith.constant 0 : i32
    %c0_i32_0 = arith.constant 0 : i32
    %c0_i32_1 = arith.constant 0 : i32
    %c0_i32_2 = arith.constant 0 : i32
    return %c0_i32, %c0_i32_0, %c0_i32_1 : i32, i32, i32
  }
  func.func @transform_2(%arg0: i32) -> (i32, i32) {
    %c0_i32 = arith.constant 0 : i32
    %c0_i32_0 = arith.constant 0 : i32
    %c0_i32_1 = arith.constant 0 : i32
    return %c0_i32, %c0_i32_0 : i32, i32
  }
  func.func @transform_3(%arg0: i32) -> (i32, i32, i32) {
    %c0_i32 = arith.constant 0 : i32
    %c0_i32_0 = arith.constant 0 : i32
    %c0_i32_1 = arith.constant 0 : i32
    %c0_i32_2 = arith.constant 0 : i32
    return %c0_i32, %c0_i32_0, %c0_i32_1 : i32, i32, i32
  }
  func.func @transform_4(%arg0: i32) -> (i32, i32) {
    %c0_i32 = arith.constant 0 : i32
    %c0_i32_0 = arith.constant 0 : i32
    %c0_i32_1 = arith.constant 0 : i32
    return %c0_i32, %c0_i32_0 : i32, i32
  }
  func.func @transform_5(%arg0: i32) -> (i32, i32, i32) {
    %c0_i32 = arith.constant 0 : i32
    %c0_i32_0 = arith.constant 0 : i32
    %c0_i32_1 = arith.constant 0 : i32
    return %arg0, %c0_i32, %c0_i32_0 : i32, i32, i32
  }
}

</mosaic_0001>

<bundles_post_ra>
// kernel: tpu_custom_call.1
= control target key start
LH: loop header
LB: loop body
LE: loop exit
PB: predicated region body
PF: predicated region fallthrough
CT: control target
= control target key end

     0   :  { %s4969_s0 = inlined_call_operand.vmem [shape: f32[2,20,160], index: 0, kind: input, shape index: {}]   ;;  %s4970_s1 = inlined_call_operand.hbm [shape: f32[9,144,144], index: 1, kind: input, shape index: {}]   ;;  %s4971_s2 = inlined_call_operand.hbm [shape: f32[1,144], index: 2, kind: input, shape index: {}]   ;;  %s4972_s3 = inlined_call_operand.hbm [shape: f32[9,128,128], index: 3, kind: input, shape index: {}]   ;;  %s4973_s4 = inlined_call_operand.hbm [shape: f32[1,128], index: 4, kind: input, shape index: {}]   ;;  %s4974_s5 = inlined_call_operand.hbm [shape: f32[2,16,128], index: 5, kind: output, shape index: {}]  }
   0x1   :  { %4978 = sst [smem:[#allocation15_spill]] %s4970_s1 }
   0x2   :  { %10 = vsyncpa [#allocation3], 0 }
   0x3   :  { %11 = vsyncpa [#allocation6], 0 }
   0x4   :  { %12 = vsyncpa [#allocation9], 0 }
   0x5   :  { %13 = vsyncpa [#allocation4], 0 }
   0x6   :  { %15 = vsyncpa [#allocation4 + $0x1], 0  ;;  %s4334_s18 = smov 0   ;;  %s4336_s19 = smov 0  }
   0x7   :  { %s4338_s20 = smov 0   ;;  %s4340_s21 = smov 0  }
   0x8 LB: > { %s4355_s22 = sadd.s32 4294967295, %s4289_s21   ;;  %s2741_s23 = sadd.s32 4294967294, %s4289_s21   ;;  %s4289_s21 = sphi %s4340_s21, %s5005_s21   ;;  %s4285_s20 = sphi %s4338_s20, %s5004_s20   ;;  %s4281_s19 = sphi %s4336_s19, %s5003_s19   ;;  %s4277_s18 = sphi %s4334_s18, %s5002_s18  }
   0x9   : > { %s4359_s24 = sadd.s32 1, %s4289_s21   ;;  %s138_s25 = sadd.s32 1, %s4285_s20 }
   0xa   : > { %s135_s26 = ssub.s32 %s4289_s21, %s4359_s24  ;;  %p148_p0 = scmp.ne.s32.totalorder %s4285_s20, %s4281_s19 }
   0xb   : > { %p136_p1 = scmp.eq.s32.totalorder %s135_s26, 0  ;;  %p149_p2 = scmp.eq.s32.totalorder %s4355_s22, 1 }
   0xc   : > { %p154_p3 = scmp.ne.s32.totalorder %s4281_s19, %s4277_s18  ;;  %p155_p4 = scmp.eq.s32.totalorder %s2741_s23, 1 }
   0xd   : > { %s4370_s27 = scalar_select %p136_p1, %s4285_s20, %s138_s25  }
   0xe   : > { %p4372_p5 = por %p149_p2, %p148_p0  ;;  %p4376_p6 = por %p155_p4, %p154_p3 }
   0xf   : > { %p2742_p7 = scmp.ge.s32.totalorder %s4289_s21, 1  ;;  %p162_p8 = scmp.lt.s32.totalorder %s4289_s21, 3 }
  0x10   : > { %s4979_s28 = scalar_select %p4372_p5, 1, 0 }
  0x11   : > { %s4980_s29 = scalar_select %p4376_p6, 1, 0 }
  0x12   : > { %p4975_p9 = scmp.eq.s32.totalorder %s4355_s22, 0  ;;  %p4383_p10 = pnand %p2742_p7, %p162_p8 }
  0x13   : > { %s4291_s6 = smov [#allocation5]   ;;  %s4292_s8 = smov [#allocation2]  }
  0x14   : > { %s4981_s30 = scalar_select %p4383_p10, 1, 0 }
  0x15   : > { %s188_s7 = sshll.u32 %s4291_s6, 4  ;;  %p3963_p11 = pneg %p4383_p10  ;;  %s189_s7 = int_to_ptr.vmem [resolvable:$true] %s188_s7 }
  0x16   : > { %s174_s9 = sshll.u32 %s4292_s8, 4  ;;  %s4293_s11 = smov [#allocation7]   ;;  %s4395_s9 = int_to_ptr.vmem [resolvable:$true] %s174_s9 }
  0x17   : > { %p4391_p12 = pnand %p4975_p9, %p3963_p11  ;;  %s4397_s12 = sshll.u32 %s4293_s11, 4  ;;  %s199_s12 = int_to_ptr.vmem [resolvable:$true] %s4397_s12 }
  0x18   : > { %s4103_s15 = scalar_lea.hbm %s4971_s2, 32 }
  0x19   : > { %p4104_p13 = scmp.ne.s32.totalorder %s4971_s2, %s4103_s15  ;;  %p4407_p0 = pneg %p4391_p12 }
  0x1a   : > { %p4110_p3 = scmp.lt.u32.totalorder %s4103_s15, %s4971_s2 }
  0x1b   : > { %p4106_p1 = pnand %p4407_p0, %p4104_p13 }
  0x1d   : > { %p4107_p2 = pneg %p4106_p1 }
  0x1f   : > { %p4112_p4 = pnand %p4110_p3, %p4107_p2 }
  0x21   : > { %4115 = shalt.err (!%p4112_p4)
}
  0x22   : > { %s4116_s6 = scalar_lea.vmem %s189_s7, 32  ;;  %p4124_p9 = scmp.lt.s32.totalorder %s189_s7, %s189_s7 }
  0x23   : > { %p4117_p7 = scmp.ne.s32.totalorder %s189_s7, %s4116_s6  ;;  %p4125_p6 = scmp.lt.s32.totalorder %s4116_s6, %s4116_s6 }
  0x25   : > { %p4119_p8 = pnand %p4117_p7, %p4407_p0  ;;  %p4126_p5 = por %p4125_p6, %p4124_p9 }
  0x27   : > { %p4120_p11 = pneg %p4119_p8 }
  0x29   : > { %p4127_p10 = pnand %p4126_p5, %p4120_p11 }
  0x2b   : > { %4130 = shalt.err (!%p4127_p10)
}
  0x2c   : > { %3969 = dma.hbm_to_vmem [thread:$0]  (!%p4391_p12), %s4971_s2, 32, %s189_s7, [#allocation6]  }
  0x2d   : > { %s4984_s1 = sld [smem:[#allocation15_spill]] }
  0x33   : > { %s4131_s15 = scalar_lea.hbm %s4984_s1, 41472 }
  0x34   : > { %p4132_p13 = scmp.ne.s32.totalorder %s4984_s1, %s4131_s15  ;;  %p4138_p5 = scmp.lt.u32.totalorder %s4131_s15, %s4984_s1 }
  0x36   : > { %p4134_p1 = pnand %p4132_p13, %p4407_p0 }
  0x38   : > { %p4135_p6 = pneg %p4134_p1 }
  0x3a   : > { %p4140_p9 = pnand %p4138_p5, %p4135_p6 }
  0x3c   : > { %4143 = shalt.err (!%p4140_p9)
}
  0x3d   : > { %s4144_s7 = scalar_lea.vmem %s4395_s9, 41472  ;;  %p4152_p4 = scmp.lt.s32.totalorder %s4395_s9, %s4395_s9 }
  0x3e   : > { %p4145_p10 = scmp.ne.s32.totalorder %s4395_s9, %s4144_s7  ;;  %p4153_p7 = scmp.lt.s32.totalorder %s4144_s7, %s4144_s7 }
  0x40   : > { %p4147_p2 = pnand %p4145_p10, %p4407_p0  ;;  %p4154_p8 = por %p4153_p7, %p4152_p4 }
  0x42   : > { %p4148_p3 = pneg %p4147_p2 }
  0x44   : > { %p4155_p11 = pnand %p4154_p8, %p4148_p3 }
  0x46   : > { %4158 = shalt.err (!%p4155_p11)
}
  0x47   : > { %s4294_s6 = smov 256   ;;  %s4295_s8 = smov 16  }
  0x48   : > { %3966 = dma.hbm_to_vmem [thread:$0]  (!%p4391_p12), %s4984_s1, 41472, %s4395_s9, [#allocation3], %s4294_s6, %s4294_s6, %s4295_s8  }
  0x49   : > { %s4159_s16 = scalar_lea.hbm %s4972_s3, 18432 }
  0x4a   : > { %p4160_p13 = scmp.ne.s32.totalorder %s4972_s3, %s4159_s16  ;;  %p4166_p5 = scmp.lt.u32.totalorder %s4159_s16, %s4972_s3 }
  0x4c   : > { %p4162_p1 = pnand %p4160_p13, %p4407_p0 }
  0x4e   : > { %p4163_p6 = pneg %p4162_p1 }
  0x50   : > { %p4168_p9 = pnand %p4166_p5, %p4163_p6 }
  0x52   : > { %4171 = shalt.err (!%p4168_p9)
}
  0x53   : > { %s4172_s11 = scalar_lea.vmem %s199_s12, 18432  ;;  %p4180_p4 = scmp.lt.s32.totalorder %s199_s12, %s199_s12 }
  0x54   : > { %p4173_p10 = scmp.ne.s32.totalorder %s199_s12, %s4172_s11  ;;  %p4181_p7 = scmp.lt.s32.totalorder %s4172_s11, %s4172_s11 }
  0x56   : > { %p4175_p2 = pnand %p4173_p10, %p4407_p0  ;;  %p4182_p8 = por %p4181_p7, %p4180_p4 }
  0x58   : > { %p4176_p3 = pneg %p4175_p2 }
  0x5a   : > { %p4183_p11 = pnand %p4182_p8, %p4176_p3 }
  0x5c   : > { %4186 = shalt.err (!%p4183_p11)
}
  0x5d   : > { %s4296_s9 = smov 128   ;;  %s4297_s6 = smov 8  }
  0x5e   : > { %3972 = dma.hbm_to_vmem [thread:$0]  (!%p4391_p12), %s4972_s3, 18432, %s199_s12, [#allocation6], %s4296_s9, %s4296_s9, %s4297_s6  }
  0x5f   : > { %s4298_s14 = smov [#allocation8]   ;;  %s4187_s25 = scalar_lea.hbm %s4973_s4, 16 }
  0x60   : > { %s212_s15 = sshll.u32 %s4298_s14, 4  ;;  %p4188_p13 = scmp.ne.s32.totalorder %s4973_s4, %s4187_s25  ;;  %s213_s15 = int_to_ptr.vmem [resolvable:$true] %s212_s15 }
  0x61   : > { %p4194_p5 = scmp.lt.u32.totalorder %s4187_s25, %s4973_s4 }
  0x62   : > { %p4190_p1 = pnand %p4188_p13, %p4407_p0 }
  0x64   : > { %p4191_p6 = pneg %p4190_p1 }
  0x66   : > { %p4196_p9 = pnand %p4194_p5, %p4191_p6 }
  0x68   : > { %4199 = shalt.err (!%p4196_p9)
}
  0x69   : > { %s4200_s12 = scalar_lea.vmem %s213_s15, 16  ;;  %s4207_s9 = scalar_lea.vmem %s213_s15, 32 }
  0x6a   : > { %p4201_p10 = scmp.ne.s32.totalorder %s213_s15, %s4200_s12  ;;  %p4208_p4 = scmp.lt.s32.totalorder %s213_s15, %s213_s15 }
  0x6b   : > { %p4209_p7 = scmp.lt.s32.totalorder %s4207_s9, %s4200_s12 }
  0x6c   : > { %p4203_p2 = pnand %p4201_p10, %p4407_p0 }
  0x6d   : > { %p4210_p8 = por %p4209_p7, %p4208_p4 }
  0x6e   : > { %p4204_p3 = pneg %p4203_p2 }
  0x70   : > { %p4211_p11 = pnand %p4210_p8, %p4204_p3 }
  0x72   : > { %4214 = shalt.err (!%p4211_p11)
}
  0x73   : > { %3975 = dma.hbm_to_vmem [thread:$0]  (!%p4391_p12), %s4973_s4, 16, %s213_s15, [#allocation9]  }
  0x74   : > { %p4985_p13 = scmp.ne.s32.totalorder %s4981_s30, 0 }
  0x75   : > { %p4986_p1 = scmp.eq.s32.totalorder (!%p4985_p13), %s4355_s22, 0 }
  0x76   : > { %233 = sbr.rel (%p4985_p13) target bundleno = 1249 (0x4e1), region = 40 }
  0x7d   : > { %4260 = dma.done.wait (%p4986_p1), [#allocation3], 41472   ;;  %p4987_p0 = pmov %p4986_p1 }
  0x7f   : > { %4262 = vsyncadd (%p4987_p0), [#allocation3], 4294925824  ;;  %p4988_p6 = pmov %p4987_p0 }
  0x80   : > { %p4989_p5 = pmov %p4987_p0 }
  0x81   : > { %4264 = dma.done.wait (%p4988_p6), [#allocation6], 18464  }
  0x82   : > { %4266 = vsyncadd (%p4989_p5), [#allocation6], 4294948832  ;;  %p4990_p9 = pmov %p4987_p0 }
  0x83   : > { %p4991_p12 = pmov %p4987_p0 }
  0x84   : > { %4268 = dma.done.wait (%p4990_p9), [#allocation9], 16  }
  0x85   : > { %4270 = vsyncadd (%p4991_p12), [#allocation9], 4294967280  ;;  %p273_p10 = scmp.lt.s32.totalorder %s4355_s22, 1  ;;  %vm382_vm0 = vcmask 130048   ;;  %s4299_s14 = smov 112   ;;  %v285_v3 = vld [vmem:[#allocation2 + $0x8] sm:$0xff] }
  0x86   : > { %v287_v5 = vld [vmem:[#allocation2 + $0x18] sm:$0xff]  ;;  %v284_v6 = vld [vmem:[#allocation2] sm:$0xff]  ;;  %v286_v8 = vld [vmem:[#allocation2 + $0x10] sm:$0xff]  ;;  %vm749_vm1 = vcmask 1046528   ;;  %s4300_s15 = smov 120   ;;  %vm1195_vm2 = vcmask 1045504  }
  0x87   : > { %s274_s1 = scalar_select %p273_p10, %s4355_s22, 1  ;;  %v3304_v7 = vpack.c.bf16 %v287_v5, %v285_v3  ;;  %v289_v9 = vld [vmem:[#allocation2 + $0x28] sm:$0xff]  ;;  %v291_v10 = vld [vmem:[#allocation2 + $0x38] sm:$0xff]  ;;  %v3306_v11 = vpack.c.bf16 %v286_v8, %v284_v6  ;;  %v288_v13 = vld [vmem:[#allocation2 + $0x20] sm:$0xff]  ;;  %vm610_vm3 = vcmask 916480   ;;  %vm375_vm4 = vcmask 982016  }
  0x88   : > { %v3308_v12 = vpack.c.bf16 %v291_v10, %v289_v9  ;;  %v290_v14 = vld [vmem:[#allocation2 + $0x30] sm:$0xff]  ;;  %v293_v16 = vld [vmem:[#allocation2 + $0x48] sm:$0xff]  ;;  %v295_v17 = vld [vmem:[#allocation2 + $0x58] sm:$0xff]  ;;  %s270_s16 = sand.u32 1, %s4281_s19   ;;  %s2790_s7 = sshll.u32 %s4355_s22, 8 }
  0x89   : > { %s3944_s30 = smul.u32 48, %s274_s1  ;;  %3305 = vmatprep.subr.bf16.mxu0 %v3304_v7  ;;  %v3310_v23 = vpack.c.bf16 %v290_v14, %v288_v13  ;;  %v3312_v24 = vpack.c.bf16 %v295_v17, %v293_v16  ;;  %v292_v25 = vld [vmem:[#allocation2 + $0x40] sm:$0xff]  ;;  %v294_v26 = vld [vmem:[#allocation2 + $0x50] sm:$0xff]  ;;  %v297_v27 = vld [vmem:[#allocation2 + $0x68] sm:$0xff]  ;;  %s2753_s17 = sshll.u32 %s270_s16, 4 }
  0x8a   : > { %3307 = vmatpush1.bf16.msra.mxu0 %v3306_v11  ;;  %v299_v28 = vld [vmem:[#allocation2 + $0x78] sm:$0xff]  ;;  %v3314_v33 = vpack.c.bf16 %v294_v26, %v292_v25  ;;  %v296_v35 = vld [vmem:[#allocation2 + $0x60] sm:$0xff]  ;;  %v298_v36 = vld [vmem:[#allocation2 + $0x70] sm:$0xff]  ;;  %s272_s25 = scalar_lea.vmem [#allocation10], %s2753_s17  ;;  %s4926_s9 = scalar_lea.hbm %s4974_s5, %s2790_s7 }
  0x8b   : > { %s277_s13 = scalar_lea.vmem %s4969_s0, %s3944_s30  ;;  %3309 = vmatprep.subr.bf16.mxu0 %v3308_v12  ;;  %v3316_v34 = vpack.c.bf16 %v299_v28, %v297_v27  ;;  %v301_v37 = vld [vmem:[#allocation2 + $0x88] sm:$0xff]  ;;  %v303_v38 = vld [vmem:[#allocation2 + $0x98] sm:$0xff]  ;;  %v3318_v41 = vpack.c.bf16 %v298_v36, %v296_v35  ;;  %v300_v43 = vld [vmem:[#allocation2 + $0x80] sm:$0xff]  ;;  %s2638_s26 = sshll.u32 %s272_s25, 4  ;;  %s4921_s26 = int_to_ptr.vmem [resolvable:$true] %s2638_s26 }
  0x8c   : > { %v4502_v0 = vld [vmem:[%s277_s13] sm:$0xff]  ;;  %v4504_v1 = vld [vmem:[%s277_s13 + $0x10] sm:$0xff]  ;;  %v4508_v2 = vld [vmem:[%s277_s13 + $0x8] sm:$0xff]  ;;  %v3320_v42 = vpack.c.bf16 %v303_v38, %v301_v37  ;;  %s4928_s6 = scalar_lea.sflag [#allocation4], %s270_s16  ;;  %s4215_s22 = scalar_lea.vmem %s4921_s26, 256 }
  0x8d   : > { %598 = vrot.lane.b32.xlu0 %v4502_v0, %s4299_s14  ;;  %602 = vrot.lane.b32.xlu1 %v4504_v1, %s4299_s14  ;;  %v4512_v4 = vld [vmem:[%s277_s13 + $0x18] sm:$0xff]  ;;  %v4520_v15 = vld [vmem:[%s277_s13 + $0x28] sm:$0xf]  ;;  %v753_v19 = vrot.slane %v4508_v2, 1  ;;  %v750_v21 = vrot.slane %v4502_v0, 1  ;;  %v751_v22 = vrot.slane %v4504_v1, 1  ;;  %p4216_p2 = scmp.ne.s32.totalorder %s4921_s26, %s4215_s22 }
  0x8e   : > { %2758 = vmatprep.mubr.msk.f32.mxu0 %vm382_vm0, %v4508_v2  ;;  %v4522_v18 = vld [vmem:[%s277_s13 + $0x20] sm:$0xf]  ;;  %v754_v20 = vrot.slane %v4512_v4, 1  ;;  %v4539_v31 = vrot.slane %v4520_v15, 1  ;;  %3311 = vmatpush1.bf16.msra.mxu0 %v3310_v23  ;;  %v302_v44 = vld [vmem:[#allocation2 + $0x90] sm:$0xff]  ;;  %v305_v45 = vld [vmem:[#allocation2 + $0xa8] sm:$0xff] }
  0x8f   : > { %v4536_v30 = vsel %vm749_vm1, %v750_v21, %v751_v22  ;;  %v4542_v32 = vrot.slane %v4522_v18, 1  ;;  %3313 = vmatprep.subr.bf16.mxu0 %v3312_v24  ;;  %v307_v46 = vld [vmem:[#allocation2 + $0xb8] sm:$0xff]  ;;  %v3322_v47 = vpack.c.bf16 %v302_v44, %v300_v43  ;;  %v304_v49 = vld [vmem:[#allocation2 + $0xa0] sm:$0xff]  ;;  %v306_v50 = vld [vmem:[#allocation2 + $0xb0] sm:$0xff]  ;;  %p5000_p3 = scmp.ne.s32.totalorder %s4979_s28, 0  ;;  %s4301_s8 = smov [#allocation10]  }
  0x90   : > { %v4533_v29 = vsel %vm749_vm1, %v753_v19, %v754_v20  ;;  %v4550_v39 = vsel %vm749_vm1, %v754_v20, %v4539_v31  ;;  %v3324_v48 = vpack.c.bf16 %v307_v46, %v305_v45  ;;  %v309_v51 = vld [vmem:[#allocation2 + $0xc8] sm:$0xff]  ;;  %v311_v52 = vld [vmem:[#allocation2 + $0xd8] sm:$0xff]  ;;  %v3326_v53 = vpack.c.bf16 %v306_v50, %v304_v49  ;;  %v308_v55 = vld [vmem:[#allocation2 + $0xc0] sm:$0xff]  ;;  %s4219_s1 = sshll.u32 %s4301_s8, 4  ;;  %s4220_s1 = int_to_ptr.vmem [resolvable:$false] %s4219_s1 }
  0x91   : > { %600 = vrot.lane.b32.xlu0 %v4508_v2, %s4299_s14  ;;  %604 = vrot.lane.b32.xlu1 %v4512_v4, %s4299_s14  ;;  %v4554_v40 = vsel %vm749_vm1, %v751_v22, %v4542_v32  ;;  %v3328_v54 = vpack.c.bf16 %v311_v52, %v309_v51  ;;  %v310_v56 = vld [vmem:[#allocation2 + $0xd0] sm:$0xff]  ;;  %v313_v57 = vld [vmem:[#allocation2 + $0xe8] sm:$0xff]  ;;  %v315_v58 = vld [vmem:[#allocation2 + $0xf8] sm:$0xff]  ;;  %v1199_v50 = vrot.slane %v4508_v2, 2  ;;  %v1200_v51 = vrot.slane %v4512_v4, 2  ;;  %p4217_p4 = pnand %p4216_p2, %p5000_p3  ;;  %s4221_s30 = scalar_lea.vmem %s4220_s1, 512 }
  0x92   : > { %3315 = vmatpush1.bf16.msra.mxu0 %v3314_v33  ;;  %v3330_v59 = vpack.c.bf16 %v310_v56, %v308_v55  ;;  %v3332_v60 = vpack.c.bf16 %v315_v58, %v313_v57  ;;  %v312_v61 = vld [vmem:[#allocation2 + $0xe0] sm:$0xff]  ;;  %v314_v62 = vld [vmem:[#allocation2 + $0xf0] sm:$0xff]  ;;  %v317_v63 = vld [vmem:[#allocation2 + $0x108] sm:$0xff]  ;;  %v1196_v55 = vrot.slane %v4502_v0, 2  ;;  %v1197_v56 = vrot.slane %v4504_v1, 2  ;;  %p4222_p8 = scmp.lt.s32.totalorder %s4921_s26, %s4220_s1  ;;  %p4223_p11 = scmp.lt.s32.totalorder %s4221_s30, %s4215_s22 }
  0x93   : > { %3317 = vmatprep.subr.bf16.mxu0 %v3316_v34  ;;  %v319_v3 = vld [vmem:[#allocation2 + $0x118] sm:$0xff]  ;;  %v3334_v5 = vpack.c.bf16 %v314_v62, %v312_v61  ;;  %v316_v7 = vld [vmem:[#allocation2 + $0x100] sm:$0xff]  ;;  %v318_v8 = vld [vmem:[#allocation2 + $0x110] sm:$0xff]  ;;  %p4218_p7 = pneg %p4217_p4 }
  0x94   : > { %v3336_v6 = vpack.c.bf16 %v319_v3, %v317_v63  ;;  %v563_v9 = vld [vmem:[#allocation2 + $0x248] sm:$0xff]  ;;  %v565_v10 = vld [vmem:[#allocation2 + $0x258] sm:$0xff]  ;;  %v3338_v11 = vpack.c.bf16 %v318_v8, %v316_v7  ;;  %v562_v13 = vld [vmem:[#allocation2 + $0x240] sm:$0xff]  ;;  %p4224_p13 = por %p4223_p11, %p4222_p8 }
  0x95   : > { %608 = vrot.lane.b32.xlu1 %v4520_v15, %s4299_s14  ;;  %606 = vrot.lane.b32.xlu0 %v4522_v18, %s4299_s14  ;;  %v3340_v12 = vpack.c.bf16 %v565_v10, %v563_v9  ;;  %v564_v14 = vld [vmem:[#allocation2 + $0x250] sm:$0xff]  ;;  %v567_v16 = vld [vmem:[#allocation2 + $0x268] sm:$0xff]  ;;  %v569_v17 = vld [vmem:[#allocation2 + $0x278] sm:$0xff] }
  0x96   : > { %3319 = vmatpush1.bf16.msra.mxu0 %v3318_v41  ;;  %v3342_v19 = vpack.c.bf16 %v564_v14, %v562_v13  ;;  %v3344_v20 = vpack.c.bf16 %v569_v17, %v567_v16  ;;  %v566_v21 = vld [vmem:[#allocation2 + $0x260] sm:$0xff]  ;;  %v568_v22 = vld [vmem:[#allocation2 + $0x270] sm:$0xff]  ;;  %v571_v23 = vld [vmem:[#allocation2 + $0x288] sm:$0xff]  ;;  %p4225_p1 = pnand %p4224_p13, %p4218_p7 }
  0x97   : > { %3321 = vmatprep.subr.bf16.mxu0 %v3320_v42  ;;  %v573_v24 = vld [vmem:[#allocation2 + $0x298] sm:$0xff]  ;;  %v3346_v25 = vpack.c.bf16 %v568_v22, %v566_v21  ;;  %v570_v27 = vld [vmem:[#allocation2 + $0x280] sm:$0xff]  ;;  %v572_v28 = vld [vmem:[#allocation2 + $0x290] sm:$0xff]  ;;  %v4598_v21 = vrot.slane %v4522_v18, 2 }
  0x98   : > { %v3348_v26 = vpack.c.bf16 %v573_v24, %v571_v23  ;;  %v575_v33 = vld [vmem:[#allocation2 + $0x2a8] sm:$0xff]  ;;  %v577_v34 = vld [vmem:[#allocation2 + $0x2b8] sm:$0xff]  ;;  %v3350_v35 = vpack.c.bf16 %v572_v28, %v570_v27  ;;  %v574_v37 = vld [vmem:[#allocation2 + $0x2a0] sm:$0xff]  ;;  %v4601_v23 = vrot.slane %v4520_v15, 2  ;;  %v4038_v28 = vpack.i.bf16 %v4504_v1, %v4502_v0 }
  0x99   : > { %897 = vrot.lane.b32.xlu1 %v4533_v29, %s4300_s15  ;;  %895 = vrot.lane.b32.xlu0 %v4536_v30, %s4300_s15  ;;  %v3352_v36 = vpack.c.bf16 %v577_v34, %v575_v33  ;;  %v576_v38 = vld [vmem:[#allocation2 + $0x2b0] sm:$0xff]  ;;  %v579_v41 = vld [vmem:[#allocation2 + $0x2c8] sm:$0xff]  ;;  %v581_v42 = vld [vmem:[#allocation2 + $0x2d8] sm:$0xff]  ;;  %v4605_v24 = vsel %vm1195_vm2, %v1197_v56, %v4598_v21 }
  0x9a   : > { %3323 = vmatpush1.bf16.msra.mxu0 %v3322_v47  ;;  %v3354_v43 = vpack.c.bf16 %v576_v38, %v574_v37  ;;  %v3356_v44 = vpack.c.bf16 %v581_v42, %v579_v41  ;;  %v578_v45 = vld [vmem:[#allocation2 + $0x2c0] sm:$0xff]  ;;  %v580_v46 = vld [vmem:[#allocation2 + $0x2d0] sm:$0xff]  ;;  %v583_v47 = vld [vmem:[#allocation2 + $0x2e8] sm:$0xff]  ;;  %v4611_v27 = vsel %vm1195_vm2, %v1200_v51, %v4601_v23 }
  0x9b   : > { %3325 = vmatprep.subr.bf16.mxu0 %v3324_v48  ;;  %v585_v48 = vld [vmem:[#allocation2 + $0x2f8] sm:$0xff]  ;;  %v3358_v49 = vpack.c.bf16 %v580_v46, %v578_v45  ;;  %v587_v57 = vld [vmem:[#allocation2 + $0x308] sm:$0xff]  ;;  %v586_v63 = vld [vmem:[#allocation2 + $0x300] sm:$0xff] }
  0x9c   : > { %v3360_v52 = vpack.c.bf16 %v585_v48, %v583_v47  ;;  %v589_v58 = vld [vmem:[#allocation2 + $0x318] sm:$0xff]  ;;  %v588_v3 = vld [vmem:[#allocation2 + $0x310] sm:$0xff]  ;;  %v590_v9 = vld [vmem:[#allocation2 + $0x320] sm:$0xff] }
  0x9d   : > { %901 = vrot.lane.b32.xlu1 %v4550_v39, %s4300_s15  ;;  %899 = vrot.lane.b32.xlu0 %v4554_v40, %s4300_s15  ;;  %v3364_v62 = vpack.c.bf16 %v589_v58, %v587_v57  ;;  %v3366_v7 = vpack.c.bf16 %v588_v3, %v586_v63  ;;  %v592_v10 = vld [vmem:[#allocation2 + $0x330] sm:$0xff]  ;;  %v594_v16 = vld [vmem:[#allocation2 + $0x340] sm:$0xff]  ;;  %v718_v33 = vld [vmem:[#allocation2 + $0x388] sm:$0xff] }
  0x9e   : > { %3327 = vmatpush1.bf16.msra.mxu0 %v3326_v53  ;;  %v582_v53 = vld [vmem:[#allocation2 + $0x2e0] sm:$0xff]  ;;  %v3370_v13 = vpack.c.bf16 %v592_v10, %v590_v9  ;;  %v596_v17 = vld [vmem:[#allocation2 + $0x350] sm:$0xff]  ;;  %v720_v34 = vld [vmem:[#allocation2 + $0x398] sm:$0xff] }
  0x9f   : > { %3329 = vmatprep.subr.bf16.mxu0 %v3328_v54  ;;  %v584_v54 = vld [vmem:[#allocation2 + $0x2f0] sm:$0xff]  ;;  %v3374_v22 = vpack.c.bf16 %v596_v17, %v594_v16  ;;  %v3380_v37 = vpack.c.bf16 %v720_v34, %v718_v33  ;;  %v722_v42 = vld [vmem:[#allocation2 + $0x3a8] sm:$0xff]  ;;  %v721_v47 = vld [vmem:[#allocation2 + $0x3a0] sm:$0xff] }
  0xa0   : > { %v3362_v61 = vpack.c.bf16 %v584_v54, %v582_v53  ;;  %v719_v38 = vld [vmem:[#allocation2 + $0x390] sm:$0xff]  ;;  %v730_v58 = vld [vmem:[#allocation2 + $0x3e8] sm:$0xff]  ;;  %v729_v3 = vld [vmem:[#allocation2 + $0x3e0] sm:$0xff] }
  0xa1   : > { %905 = vrot.lane.b32.xlu1 %v4539_v31, %s4300_s15  ;;  %903 = vrot.lane.b32.xlu0 %v4542_v32, %s4300_s15  ;;  %v723_v48 = vld [vmem:[#allocation2 + $0x3b0] sm:$0xff]  ;;  %v733_v10 = vld [vmem:[#allocation2 + $0x400] sm:$0xff] }
  0xa2   : > { %3331 = vmatpush1.bf16.msra.mxu0 %v3330_v59  ;;  %v4588_v59 = vsel %vm1195_vm2, %v1199_v50, %v1200_v51  ;;  %v726_v51 = vld [vmem:[#allocation2 + $0x3c8] sm:$0xff]  ;;  %v3386_v53 = vpack.c.bf16 %v723_v48, %v721_v47  ;;  %v727_v57 = vld [vmem:[#allocation2 + $0x3d0] sm:$0xff]  ;;  %v737_v17 = vld [vmem:[#allocation2 + $0x420] sm:$0xff] }
  0xa3   : > { %3333 = vmatprep.subr.bf16.mxu0 %v3332_v60  ;;  %v4593_v60 = vsel %vm1195_vm2, %v1196_v55, %v1197_v56  ;;  %v725_v56 = vld [vmem:[#allocation2 + $0x3c0] sm:$0xff]  ;;  %v747_v34 = vld [vmem:[#allocation2 + $0x470] sm:$0xff] }
  0xa4   : > { %v745_v33 = vld [vmem:[#allocation2 + $0x460] sm:$0xff]  ;;  %v865_v48 = vld [vmem:[#allocation2 + $0x4b0] sm:$0xff] }
  0xa5   : > { %1047 = vrot.lane.b32.xlu1 %v4533_v29, %s4299_s14  ;;  %1045 = vrot.lane.b32.xlu0 %v4536_v30, %s4299_s14  ;;  %v863_v47 = vld [vmem:[#allocation2 + $0x4a0] sm:$0xff] }
  0xa6   : > { %3335 = vmatpush1.bf16.msra.mxu0 %v3334_v5  ;;  %v591_v5 = vld [vmem:[#allocation2 + $0x328] sm:$0xff] }
  0xa7   : > { %3337 = vmatprep.subr.bf16.mxu0 %v3336_v6  ;;  %v593_v6 = vld [vmem:[#allocation2 + $0x338] sm:$0xff] }
  0xa8   : > { %v3368_v8 = vpack.c.bf16 %v593_v6, %v591_v5  ;;  %v731_v5 = vld [vmem:[#allocation2 + $0x3f0] sm:$0xff]  ;;  %v734_v6 = vld [vmem:[#allocation2 + $0x408] sm:$0xff] }
  0xa9   : > { %1051 = vrot.lane.b32.xlu1 %v4550_v39, %s4299_s14  ;;  %1049 = vrot.lane.b32.xlu0 %v4554_v40, %s4299_s14 }
  0xaa   : > { %3339 = vmatpush1.bf16.msra.mxu0 %v3338_v11  ;;  %v595_v11 = vld [vmem:[#allocation2 + $0x348] sm:$0xff] }
  0xab   : > { %3341 = vmatprep.subr.bf16.mxu0 %v3340_v12  ;;  %v597_v12 = vld [vmem:[#allocation2 + $0x358] sm:$0xff] }
  0xac   : > { %v3372_v14 = vpack.c.bf16 %v597_v12, %v595_v11  ;;  %v735_v11 = vld [vmem:[#allocation2 + $0x410] sm:$0xff]  ;;  %v738_v12 = vld [vmem:[#allocation2 + $0x428] sm:$0xff] }
  0xad   : > { %1055 = vrot.lane.b32.xlu1 %v4539_v31, %s4299_s14  ;;  %1053 = vrot.lane.b32.xlu0 %v4542_v32, %s4299_s14 }
  0xae   : > { %543 = vmatmul.mubr.f32.vlgmr.msra.gmra.mrb[0].mxu0 %v4502_v0 }
  0xaf   : > { %3343 = vmatpush1.bf16.msra.mxu0 %v3342_v19  ;;  %2759 = vmatprep.mubr.msk.f32.mxu0 %vm382_vm0, %v4512_v4  ;;  %v714_v19 = vld [vmem:[#allocation2 + $0x368] sm:$0xff] }
  0xb0   : > { %3345 = vmatprep.subr.bf16.mxu0 %v3344_v20  ;;  %v716_v20 = vld [vmem:[#allocation2 + $0x378] sm:$0xff] }
  0xb1   : > { %1343 = vrot.lane.b32.xlu1 %v4588_v59, %s4300_s15  ;;  %1341 = vrot.lane.b32.xlu0 %v4593_v60, %s4300_s15 }
  0xb2   : > { %549 = vmatmul.mubr.f32.gmra.mrb[2].mxu0 %v4504_v1  ;;  %v713_v1 = vld [vmem:[#allocation2 + $0x360] sm:$0xff] }
  0xb3   : > { %3347 = vmatpush1.bf16.msra.mxu0 %v3346_v25  ;;  %2760 = vmatprep.mubr.msk.f32.mxu0 %vm382_vm0, %v4520_v15  ;;  %v3376_v25 = vpack.c.bf16 %v716_v20, %v714_v19  ;;  %v742_v19 = vld [vmem:[#allocation2 + $0x448] sm:$0xff]  ;;  %v744_v20 = vld [vmem:[#allocation2 + $0x458] sm:$0xff] }
  0xb4   : > { %3349 = vmatprep.subr.bf16.mxu0 %v3348_v26  ;;  %v4033_v26 = vpack.i.bf16 %v4598_v21, %v4605_v24 }
  0xb5   : > { %1347 = vrot.lane.b32.xlu1 %v4611_v27, %s4300_s15 }
  0xb6   : > { %555 = vmatmul.mubr.f32.gmra.mrb[4].mxu0 %v4522_v18  ;;  %4034 = vrot.lane.b32.xlu0 %v4033_v26, %s4300_s15  ;;  %v741_v26 = vld [vmem:[#allocation2 + $0x440] sm:$0xff] }
  0xb7   : > { %3351 = vmatpush1.bf16.msra.mxu0 %v3350_v35 }
  0xb8   : > { %3353 = vmatprep.subr.bf16.mxu0 %v3352_v36 }
  0xb9   : > { %4039 = vrot.lane.b32.xlu1 %v4038_v28, %s4300_s15  ;;  %v743_v28 = vld [vmem:[#allocation2 + $0x450] sm:$0xff] }
  0xba   : > { %1351 = vrot.lane.b32.xlu0 %v4601_v23, %s4300_s15 }
  0xbb   : > { %3355 = vmatpush1.bf16.msra.mxu0 %v3354_v43  ;;  %v724_v43 = vld [vmem:[#allocation2 + $0x3b8] sm:$0xff] }
  0xbc   : > { %3357 = vmatprep.subr.bf16.mxu0 %v3356_v44  ;;  %v3384_v46 = vpack.c.bf16 %v724_v43, %v722_v42  ;;  %v866_v42 = vld [vmem:[#allocation2 + $0x4b8] sm:$0xff] }
  0xbd   : > { %1491 = vrot.lane.b32.xlu1 %v4593_v60, %s4299_s14 }
  0xbe   : > { %365 = vrot.lane.b32.xlu0 %v4508_v2, %s4300_s15  ;;  %v715_v2 = vld [vmem:[#allocation2 + $0x370] sm:$0xff] }
  0xbf   : > { %3359 = vmatpush1.bf16.msra.mxu0 %v3358_v49  ;;  %v3378_v35 = vpack.c.bf16 %v715_v2, %v713_v1  ;;  %v748_v1 = vld [vmem:[#allocation2 + $0x478] sm:$0xff]  ;;  %v3406_v2 = vpack.c.bf16 %v743_v28, %v741_v26  ;;  %v330_v26 = vld [vmem:[#allocation2 + $0x168] sm:$0xff] }
  0xc0   : > { %3361 = vmatprep.subr.bf16.mxu0 %v3360_v52  ;;  %v728_v52 = vld [vmem:[#allocation2 + $0x3d8] sm:$0xff] }
  0xc1   : > { %369 = vrot.lane.b32.xlu1 %v4512_v4, %s4300_s15  ;;  %v3388_v55 = vpack.c.bf16 %v728_v52, %v726_v51  ;;  %v3418_v51 = vpack.c.bf16 %v865_v48, %v863_v47  ;;  %v867_v52 = vld [vmem:[#allocation2 + $0x4c0] sm:$0xff]  ;;  %v332_v28 = vld [vmem:[#allocation2 + $0x178] sm:$0xff]  ;;  %v335_v47 = vld [vmem:[#allocation2 + $0x190] sm:$0xff] }
  0xc2   : > { %1493 = vrot.lane.b32.xlu0 %v4588_v59, %s4299_s14 }
  0xc3   : > { %3363 = vmatpush1.bf16.msra.mxu0 %v3362_v61  ;;  %v732_v61 = vld [vmem:[#allocation2 + $0x3f8] sm:$0xff] }
  0xc4   : > { %3365 = vmatprep.subr.bf16.mxu0 %v3364_v62  ;;  %v3390_v62 = vpack.c.bf16 %v727_v57, %v725_v56  ;;  %v3392_v63 = vpack.c.bf16 %v732_v61, %v730_v58  ;;  %v872_v57 = vld [vmem:[#allocation2 + $0x4e8] sm:$0xff]  ;;  %v324_v61 = vld [vmem:[#allocation2 + $0x138] sm:$0xff] }
  0xc5   : > { %1497 = vrot.lane.b32.xlu1 %v4611_v27, %s4299_s14  ;;  %v322_v58 = vld [vmem:[#allocation2 + $0x128] sm:$0xff] }
  0xc6   : > { %1495 = vrot.lane.b32.xlu0 %v4605_v24, %s4299_s14 }
  0xc7   : > { %3367 = vmatpush1.bf16.msra.mxu0 %v3366_v7  ;;  %v736_v7 = vld [vmem:[#allocation2 + $0x418] sm:$0xff] }
  0xc8   : > { %3369 = vmatprep.subr.bf16.mxu0 %v3368_v8  ;;  %v3394_v8 = vpack.c.bf16 %v731_v5, %v729_v3  ;;  %v3396_v9 = vpack.c.bf16 %v736_v7, %v734_v6  ;;  %v321_v3 = vld [vmem:[#allocation2 + $0x120] sm:$0xff] }
  0xc9   : > { %373 = vrot.lane.b32.xlu1 %v4520_v15, %s4300_s15  ;;  %v717_v15 = vld [vmem:[#allocation2 + $0x380] sm:$0xff] }
  0xca   : > { %371 = vrot.lane.b32.xlu0 %v4522_v18, %s4300_s15  ;;  %v3382_v44 = vpack.c.bf16 %v719_v38, %v717_v15  ;;  %v859_v38 = vld [vmem:[#allocation2 + $0x480] sm:$0xff] }
  0xcb   : > { %3371 = vmatpush1.bf16.msra.mxu0 %v3370_v13  ;;  %v740_v13 = vld [vmem:[#allocation2 + $0x438] sm:$0xff]  ;;  %v871_v7 = vld [vmem:[#allocation2 + $0x4e0] sm:$0xff] }
  0xcc   : > { %3373 = vmatprep.subr.bf16.mxu0 %v3372_v14  ;;  %v3398_v14 = vpack.c.bf16 %v735_v11, %v733_v10  ;;  %v3400_v16 = vpack.c.bf16 %v740_v13, %v738_v12  ;;  %v326_v10 = vld [vmem:[#allocation2 + $0x148] sm:$0xff]  ;;  %v328_v11 = vld [vmem:[#allocation2 + $0x158] sm:$0xff] }
  0xcd   : > { %1501 = vrot.lane.b32.xlu1 %v4601_v23, %s4299_s14  ;;  %v878_v12 = vld [vmem:[#allocation2 + $0x518] sm:$0xff] }
  0xce   : > { %1499 = vrot.lane.b32.xlu0 %v4598_v21, %s4299_s14 }
  0xcf   : > { %3375 = vmatpush1.bf16.msra.mxu0 %v3374_v22 }
  0xd0   : > { %3377 = vmatprep.subr.bf16.mxu0 %v3376_v25  ;;  %v3404_v25 = vpack.c.bf16 %v744_v20, %v742_v19  ;;  %v875_v19 = vld [vmem:[#allocation2 + $0x500] sm:$0xff]  ;;  %v877_v20 = vld [vmem:[#allocation2 + $0x510] sm:$0xff] }
  0xff   : > { %v599_v0 = vpop.permute.xlu0 %598  ;;  %v603_v4 = vpop.permute.xlu1 %602 }
 0x103   : > { %v601_v36 = vpop.permute.xlu0 %600  ;;  %v605_v41 = vpop.permute.xlu1 %604 }
 0x104   : > { %v611_v18 = vsel %vm610_vm3, %v599_v0, %v601_v36  ;;  %2761 = vmatprep.mubr.msk.f32.mxu0 %vm382_vm0, %v601_v36  ;;  %v612_v45 = vsel %vm610_vm3, %v603_v4, %v605_v41  ;;  %v746_v0 = vld [vmem:[#allocation2 + $0x468] sm:$0xff]  ;;  %v862_v36 = vld [vmem:[#allocation2 + $0x498] sm:$0xff] }
 0x105   : > { %688 = vmatmul.mubr.f32.vlgmr.msra.gmra.mrb[0].mxu0 %v611_v18  ;;  %v3408_v4 = vpack.c.bf16 %v748_v1, %v746_v0  ;;  %v864_v18 = vld [vmem:[#allocation2 + $0x4a8] sm:$0xff]  ;;  %v882_v0 = vld [vmem:[#allocation2 + $0x538] sm:$0xff]  ;;  %v3276_v1 = vpack.c.bf16 %v332_v28, %v330_v26 }
 0x106   : > { %3379 = vmatpush1.bf16.msra.mxu0 %v3378_v35  ;;  %2762 = vmatprep.mubr.msk.f32.mxu0 %vm382_vm0, %v605_v41  ;;  %v860_v35 = vld [vmem:[#allocation2 + $0x488] sm:$0xff]  ;;  %v861_v41 = vld [vmem:[#allocation2 + $0x490] sm:$0xff] }
 0x107   : > { %3381 = vmatprep.subr.bf16.mxu0 %v3380_v37  ;;  %v609_v49 = vpop.permute.xlu1 %608  ;;  %v607_v50 = vpop.permute.xlu0 %606  ;;  %v3410_v37 = vpack.c.bf16 %v747_v34, %v745_v33  ;;  %v3412_v15 = vpack.c.bf16 %v862_v36, %v860_v35  ;;  %v3414_v43 = vpack.c.bf16 %v861_v41, %v859_v38  ;;  %v3430_v33 = vpack.c.bf16 %v877_v20, %v875_v19  ;;  %v879_v34 = vld [vmem:[#allocation2 + $0x520] sm:$0xff]  ;;  %v881_v35 = vld [vmem:[#allocation2 + $0x530] sm:$0xff]  ;;  %v884_v38 = vld [vmem:[#allocation2 + $0x548] sm:$0xff] }
 0x108   : > { %v613_v54 = vsel %vm610_vm3, %v607_v50, %v609_v49  ;;  %v870_v50 = vld [vmem:[#allocation2 + $0x4d8] sm:$0xff]  ;;  %v334_v41 = vld [vmem:[#allocation2 + $0x188] sm:$0xff] }
 0x109   : > { %694 = vmatmul.mubr.f32.gmra.mrb[2].mxu0 %v612_v45  ;;  %v1010_v28 = vld [vmem:[#allocation2 + $0x5a8] sm:$0xff] }
 0x10a   : > { %3383 = vmatpush1.bf16.msra.mxu0 %v3382_v44  ;;  %2763 = vmatprep.mubr.msk.f32.mxu0 %vm382_vm0, %v609_v49  ;;  %v868_v49 = vld [vmem:[#allocation2 + $0x4c8] sm:$0xff] }
 0x10b   : > { %3385 = vmatprep.subr.bf16.mxu0 %v3384_v46  ;;  %v4649_v44 = vpop.permute.xlu1 %897  ;;  %v4651_v45 = vpop.permute.xlu0 %895  ;;  %v3416_v46 = vpack.c.bf16 %v866_v42, %v864_v18  ;;  %v3420_v56 = vpack.c.bf16 %v870_v50, %v868_v49  ;;  %v336_v18 = vld [vmem:[#allocation2 + $0x198] sm:$0xff]  ;;  %v3434_v49 = vpack.c.bf16 %v881_v35, %v879_v34  ;;  %v883_v50 = vld [vmem:[#allocation2 + $0x540] sm:$0xff]  ;;  %v347_v35 = vld [vmem:[#allocation2 + $0x1f0] sm:$0xff] }
 0x10c   : > { %v886_v42 = vld [vmem:[#allocation2 + $0x558] sm:$0xff]  ;;  %v345_v34 = vld [vmem:[#allocation2 + $0x1e0] sm:$0xff] }
 0x10d   : > { %700 = vmatmul.mubr.f32.gmra.mrb[4].mxu0 %v613_v54 }
 0x10e   : > { %3387 = vmatpush1.bf16.msra.mxu0 %v3386_v53  ;;  %2764 = vmatprep.mubr.msk.f32.mxu0 %vm382_vm0, %v4533_v29  ;;  %v739_v29 = vld [vmem:[#allocation2 + $0x430] sm:$0xff] }
 0x10f   : > { %3389 = vmatprep.subr.bf16.mxu0 %v3388_v55  ;;  %v3402_v22 = vpack.c.bf16 %v739_v29, %v737_v17  ;;  %v869_v53 = vld [vmem:[#allocation2 + $0x4d0] sm:$0xff]  ;;  %v4656_v54 = vpop.permute.xlu1 %901  ;;  %v4658_v55 = vpop.permute.xlu0 %899 }
 0x110   : > { %v3422_v6 = vpack.c.bf16 %v869_v53, %v867_v52  ;;  %v327_v17 = vld [vmem:[#allocation2 + $0x150] sm:$0xff] }
 0x112   : > { %3391 = vmatpush1.bf16.msra.mxu0 %v3390_v62  ;;  %v874_v62 = vld [vmem:[#allocation2 + $0x4f8] sm:$0xff] }
 0x113   : > { %3393 = vmatprep.subr.bf16.mxu0 %v3392_v63  ;;  %v3268_v63 = vpack.c.bf16 %v324_v61, %v322_v58  ;;  %v4663_v13 = vpop.permute.xlu1 %905  ;;  %v338_v58 = vld [vmem:[#allocation2 + $0x1a8] sm:$0xff]  ;;  %v340_v61 = vld [vmem:[#allocation2 + $0x1b8] sm:$0xff] }
 0x115   : > { %3269 = vmatprep.subr.bf16.mxu1 %v3268_v63  ;;  %v3284_v63 = vpack.c.bf16 %v340_v61, %v338_v58  ;;  %v907_v61 = vsel %vm375_vm4, %v4651_v45, %v4649_v44 }
 0x116   : > { %3395 = vmatpush1.bf16.msra.mxu0 %v3394_v8  ;;  %v3424_v8 = vpack.c.bf16 %v874_v62, %v872_v57  ;;  %v888_v57 = vld [vmem:[#allocation2 + $0x568] sm:$0xff]  ;;  %v890_v62 = vld [vmem:[#allocation2 + $0x578] sm:$0xff] }
 0x117   : > { %3397 = vmatprep.subr.bf16.mxu0 %v3396_v9  ;;  %v876_v9 = vld [vmem:[#allocation2 + $0x508] sm:$0xff]  ;;  %v4670_v36 = vpop.permute.xlu1 %1047 }
 0x11a   : > { %3399 = vmatpush1.bf16.msra.mxu0 %v3398_v14  ;;  %v4665_v14 = vpop.permute.xlu0 %903 }
 0x11b   : > { %3401 = vmatprep.subr.bf16.mxu0 %v3400_v16  ;;  %v325_v16 = vld [vmem:[#allocation2 + $0x140] sm:$0xff]  ;;  %v4674_v52 = vpop.permute.xlu1 %1051 }
 0x11c   : > { %v3274_v29 = vpack.c.bf16 %v327_v17, %v325_v16 }
 0x11e   : > { %3403 = vmatpush1.bf16.msra.mxu0 %v3402_v22  ;;  %v3428_v22 = vpack.c.bf16 %v878_v12, %v876_v9  ;;  %v892_v9 = vld [vmem:[#allocation2 + $0x588] sm:$0xff]  ;;  %v894_v12 = vld [vmem:[#allocation2 + $0x598] sm:$0xff] }
 0x11f   : > { %3405 = vmatprep.subr.bf16.mxu0 %v3404_v25  ;;  %v880_v25 = vld [vmem:[#allocation2 + $0x528] sm:$0xff]  ;;  %v3444_v26 = vpack.c.bf16 %v894_v12, %v892_v9  ;;  %v355_v12 = vld [vmem:[#allocation2 + $0x230] sm:$0xff] }
 0x122   : > { %3407 = vmatpush1.bf16.msra.mxu0 %v3406_v2  ;;  %v329_v2 = vld [vmem:[#allocation2 + $0x160] sm:$0xff] }
 0x123   : > { %3409 = vmatprep.subr.bf16.mxu0 %v3408_v4  ;;  %v331_v4 = vld [vmem:[#allocation2 + $0x170] sm:$0xff] }
 0x126   : > { %3411 = vmatpush1.bf16.msra.mxu0 %v3410_v37  ;;  %v4672_v37 = vpop.permute.xlu0 %1045 }
 0x127   : > { %3413 = vmatprep.subr.bf16.mxu0 %v3412_v15  ;;  %v3432_v15 = vpack.c.bf16 %v882_v0, %v880_v25  ;;  %v893_v25 = vld [vmem:[#allocation2 + $0x590] sm:$0xff]  ;;  %v346_v0 = vld [vmem:[#allocation2 + $0x1e8] sm:$0xff] }
 0x129   : > { %834 = vmatmul.mubr.f32.vlgmr.msra.gmra.mrb[0].mxu0 %v4536_v30  ;;  %v323_v30 = vld [vmem:[#allocation2 + $0x130] sm:$0xff] }
 0x12a   : > { %3415 = vmatpush1.bf16.msra.mxu0 %v3414_v43  ;;  %2765 = vmatprep.mubr.msk.f32.mxu0 %vm382_vm0, %v4550_v39  ;;  %v3270_v5 = vpack.c.bf16 %v323_v30, %v321_v3  ;;  %v873_v39 = vld [vmem:[#allocation2 + $0x4f0] sm:$0xff]  ;;  %v3280_v43 = vpack.c.bf16 %v336_v18, %v334_v41  ;;  %v4676_v53 = vpop.permute.xlu0 %1049  ;;  %v337_v3 = vld [vmem:[#allocation2 + $0x1a0] sm:$0xff] }
 0x12b   : > { %3417 = vmatprep.subr.bf16.mxu0 %v3416_v46  ;;  %v333_v46 = vld [vmem:[#allocation2 + $0x180] sm:$0xff]  ;;  %v339_v30 = vld [vmem:[#allocation2 + $0x1b0] sm:$0xff] }
 0x12c   : > { %3271 = vmatpush1.bf16.msra.mxu1 %v3270_v5  ;;  %v3282_v48 = vpack.c.bf16 %v335_v47, %v333_v46  ;;  %v3286_v5 = vpack.c.bf16 %v339_v30, %v337_v3  ;;  %v1009_v41 = vld [vmem:[#allocation2 + $0x5a0] sm:$0xff]  ;;  %v1011_v18 = vld [vmem:[#allocation2 + $0x5b0] sm:$0xff]  ;;  %v350_v46 = vld [vmem:[#allocation2 + $0x208] sm:$0xff] }
 0x12d   : > { %840 = vmatmul.mubr.f32.gmra.mrb[2].mxu0 %v4554_v40  ;;  %v3272_v40 = vpack.c.bf16 %v328_v11, %v326_v10  ;;  %v342_v10 = vld [vmem:[#allocation2 + $0x1c8] sm:$0xff]  ;;  %v344_v11 = vld [vmem:[#allocation2 + $0x1d8] sm:$0xff]  ;;  %v1015_v3 = vld [vmem:[#allocation2 + $0x5d0] sm:$0xff] }
 0x12e   : > { %3419 = vmatpush1.bf16.msra.mxu0 %v3418_v51  ;;  %2766 = vmatprep.mubr.msk.f32.mxu0 %vm382_vm0, %v4539_v31  ;;  %v3426_v31 = vpack.c.bf16 %v873_v39, %v871_v7  ;;  %v885_v51 = vld [vmem:[#allocation2 + $0x550] sm:$0xff]  ;;  %v887_v7 = vld [vmem:[#allocation2 + $0x560] sm:$0xff]  ;;  %v4680_v16 = vpop.permute.xlu0 %1053  ;;  %v3288_v17 = vpack.c.bf16 %v344_v11, %v342_v10  ;;  %v352_v47 = vld [vmem:[#allocation2 + $0x218] sm:$0xff] }
 0x12f   : > { %3421 = vmatprep.subr.bf16.mxu0 %v3420_v56  ;;  %3273 = vmatprep.subr.bf16.mxu1 %v3272_v40  ;;  %v3436_v56 = vpack.c.bf16 %v886_v42, %v884_v38  ;;  %v889_v39 = vld [vmem:[#allocation2 + $0x570] sm:$0xff]  ;;  %v4678_v40 = vpop.permute.xlu1 %1055  ;;  %v353_v11 = vld [vmem:[#allocation2 + $0x220] sm:$0xff] }
 0x130   : > { %3275 = vmatpush1.bf16.msra.mxu1 %v3274_v29  ;;  %v341_v29 = vld [vmem:[#allocation2 + $0x1c0] sm:$0xff]  ;;  %v3442_v20 = vpack.c.bf16 %v889_v39, %v887_v7  ;;  %v356_v7 = vld [vmem:[#allocation2 + $0x238] sm:$0xff] }
 0x131   : > { %846 = vmatmul.mubr.f32.gmra.mrb[4].mxu0 %v4542_v32  ;;  %v3278_v32 = vpack.c.bf16 %v331_v4, %v329_v2  ;;  %3277 = vmatprep.subr.bf16.mxu1 %v3276_v1  ;;  %v348_v1 = vld [vmem:[#allocation2 + $0x1f8] sm:$0xff] }
 0x132   : > { %3423 = vmatpush1.bf16.msra.mxu0 %v3422_v6  ;;  %2767 = vmatprep.mubr.msk.f32.mxu0 %vm382_vm0, %v4649_v44  ;;  %v3438_v6 = vpack.c.bf16 %v885_v51, %v883_v50  ;;  %v1012_v2 = vld [vmem:[#allocation2 + $0x5b8] sm:$0xff]  ;;  %v3296_v51 = vpack.c.bf16 %v352_v47, %v350_v46  ;;  %v3302_v44 = vpack.c.bf16 %v355_v12, %v353_v11  ;;  %v1030_v46 = vld [vmem:[#allocation2 + $0x648] sm:$0xff] }
 0x133   : > { %3425 = vmatprep.subr.bf16.mxu0 %v3424_v8  ;;  %v3440_v8 = vpack.c.bf16 %v890_v62, %v888_v57  ;;  %v4682_v4 = vpop.permute.xlu1 %1343  ;;  %v3448_v42 = vpack.c.bf16 %v1012_v2, %v1010_v28  ;;  %v351_v57 = vld [vmem:[#allocation2 + $0x210] sm:$0xff]  ;;  %v3450_v62 = vpack.c.bf16 %v1011_v18, %v1009_v41  ;;  %v1020_v39 = vld [vmem:[#allocation2 + $0x5f8] sm:$0xff] }
 0x134   : > { %3279 = vmatpush1.bf16.msra.mxu1 %v3278_v32  ;;  %v4684_v32 = vpop.permute.xlu0 %1341  ;;  %v1032_v47 = vld [vmem:[#allocation2 + $0x658] sm:$0xff] }
 0x135   : > { %3281 = vmatprep.subr.bf16.mxu1 %v3280_v43  ;;  %v1014_v43 = vld [vmem:[#allocation2 + $0x5c8] sm:$0xff] }
 0x136   : > { %3427 = vmatpush1.bf16.msra.mxu0 %v3426_v31  ;;  %v343_v31 = vld [vmem:[#allocation2 + $0x1d0] sm:$0xff] }
 0x137   : > { %3429 = vmatprep.subr.bf16.mxu0 %v3428_v22  ;;  %v3290_v19 = vpack.c.bf16 %v343_v31, %v341_v29  ;;  %v891_v22 = vld [vmem:[#allocation2 + $0x580] sm:$0xff]  ;;  %v908_v29 = vsel %vm375_vm4, %v4658_v55, %v4656_v54 }
 0x138   : > { %3283 = vmatpush1.bf16.msra.mxu1 %v3282_v48  ;;  %v3446_v38 = vpack.c.bf16 %v893_v25, %v891_v22  ;;  %v1016_v48 = vld [vmem:[#allocation2 + $0x5d8] sm:$0xff]  ;;  %v4688_v50 = vpop.permute.xlu0 %4034  ;;  %v1022_v22 = vld [vmem:[#allocation2 + $0x608] sm:$0xff] }
 0x139   : > { %3285 = vmatprep.subr.bf16.mxu1 %v3284_v63  ;;  %v1013_v63 = vld [vmem:[#allocation2 + $0x5c0] sm:$0xff]  ;;  %v3452_v30 = vpack.c.bf16 %v1016_v48, %v1014_v43  ;;  %v1024_v25 = vld [vmem:[#allocation2 + $0x618] sm:$0xff]  ;;  %v1027_v43 = vld [vmem:[#allocation2 + $0x630] sm:$0xff] }
 0x13a   : > { %3431 = vmatpush1.bf16.msra.mxu0 %v3430_v33  ;;  %v3292_v33 = vpack.c.bf16 %v348_v1, %v346_v0  ;;  %v3454_v45 = vpack.c.bf16 %v1015_v3, %v1013_v63  ;;  %v3460_v55 = vpack.c.bf16 %v1024_v25, %v1022_v22  ;;  %v1036_v63 = vld [vmem:[#allocation2 + $0x678] sm:$0xff] }
 0x13b   : > { %3433 = vmatprep.subr.bf16.mxu0 %v3432_v15  ;;  %v3294_v15 = vpack.c.bf16 %v347_v35, %v345_v34  ;;  %v1023_v34 = vld [vmem:[#allocation2 + $0x610] sm:$0xff]  ;;  %v1026_v35 = vld [vmem:[#allocation2 + $0x628] sm:$0xff] }
 0x13c   : > { %3287 = vmatpush1.bf16.msra.mxu1 %v3286_v5  ;;  %v1018_v5 = vld [vmem:[#allocation2 + $0x5e8] sm:$0xff]  ;;  %v4693_v9 = vpop.permute.xlu0 %1351  ;;  %v1668_v22 = vld [vmem:[#allocation7 + $0x10] sm:$0xff] }
 0x13d   : > { %3289 = vmatprep.subr.bf16.mxu1 %v3288_v17  ;;  %v3456_v31 = vpack.c.bf16 %v1020_v39, %v1018_v5  ;;  %v1038_v39 = vld [vmem:[#allocation2 + $0x688] sm:$0xff] }
 0x13e   : > { %3435 = vmatpush1.bf16.msra.mxu0 %v3434_v49  ;;  %v4686_v49 = vpop.permute.xlu1 %1347 }
 0x13f   : > { %3437 = vmatprep.subr.bf16.mxu0 %v3436_v56  ;;  %v349_v56 = vld [vmem:[#allocation2 + $0x200] sm:$0xff] }
 0x140   : > { %3291 = vmatpush1.bf16.msra.mxu1 %v3290_v19  ;;  %v3298_v58 = vpack.c.bf16 %v351_v57, %v349_v56  ;;  %v1017_v19 = vld [vmem:[#allocation2 + $0x5e0] sm:$0xff]  ;;  %v366_v28 = vpop.permute.xlu0 %365  ;;  %v3468_v56 = vpack.c.bf16 %v1032_v47, %v1030_v46  ;;  %v1166_v46 = vld [vmem:[#allocation2 + $0x6f8] sm:$0xff]  ;;  %v1057_v47 = vsel %vm610_vm3, %v4672_v37, %v4670_v36 }
 0x141   : > { %3293 = vmatprep.subr.bf16.mxu1 %v3292_v33  ;;  %2755 = vmatprep.mubr.msk.f32.mxu1 %vm382_vm0, %v366_v28  ;;  %v1021_v33 = vld [vmem:[#allocation2 + $0x600] sm:$0xff] }
 0x142   : > { %3439 = vmatpush1.bf16.msra.mxu0 %v3438_v6  ;;  %v354_v6 = vld [vmem:[#allocation2 + $0x228] sm:$0xff]  ;;  %v3462_v18 = vpack.c.bf16 %v1023_v34, %v1021_v33  ;;  %v1029_v57 = vld [vmem:[#allocation2 + $0x640] sm:$0xff] }
 0x143   : > { %3441 = vmatprep.subr.bf16.mxu0 %v3440_v8  ;;  %v4040_v8 = vpop.permute.xlu1 %4039  ;;  %v3300_v10 = vpack.c.bf16 %v356_v7, %v354_v6  ;;  %v1033_v6 = vld [vmem:[#allocation2 + $0x660] sm:$0xff]  ;;  %v1035_v7 = vld [vmem:[#allocation2 + $0x670] sm:$0xff] }
 0x144   : > { %3295 = vmatpush1.bf16.msra.mxu1 %v3294_v15  ;;  %v4041_v17 = vunpack.i.l.bf16 %v4040_v8  ;;  %v4042_v0 = vunpack.i.h.bf16 %v4040_v8  ;;  %v1028_v15 = vld [vmem:[#allocation2 + $0x638] sm:$0xff]  ;;  %v3474_v11 = vpack.c.bf16 %v1035_v7, %v1033_v6  ;;  %v1670_v33 = vld [vmem:[#allocation7 + $0x20] sm:$0xff]  ;;  %v1671_v34 = vld [vmem:[#allocation7 + $0x28] sm:$0xff] }
 0x145   : > { %3297 = vmatprep.subr.bf16.mxu1 %v3296_v51  ;;  %v1040_v8 = vld [vmem:[#allocation2 + $0x698] sm:$0xff]  ;;  %v1167_v37 = vld [vmem:[#allocation2 + $0x700] sm:$0xff]  ;;  %v1172_v6 = vld [vmem:[#allocation2 + $0x728] sm:$0xff] }
 0x146   : > { %3443 = vmatpush1.bf16.msra.mxu0 %v3442_v20  ;;  %v1019_v20 = vld [vmem:[#allocation2 + $0x5f0] sm:$0xff]  ;;  %v376_v1 = vsel %vm375_vm4, %v4041_v17, %v366_v28  ;;  %v3476_v17 = vpack.c.bf16 %v1040_v8, %v1038_v39  ;;  %v1041_v28 = vld [vmem:[#allocation2 + $0x6a0] sm:$0xff]  ;;  %v1174_v7 = vld [vmem:[#allocation2 + $0x738] sm:$0xff]  ;;  %v1059_v8 = vsel %vm610_vm3, %v4680_v16, %v4678_v40 }
 0x147   : > { %3445 = vmatprep.subr.bf16.mxu0 %v3444_v26  ;;  %v4700_v26 = vpop.permute.xlu1 %1491  ;;  %v3458_v2 = vpack.c.bf16 %v1019_v20, %v1017_v19  ;;  %v1666_v19 = vld [vmem:[#allocation7] sm:$0xff]  ;;  %v1667_v20 = vld [vmem:[#allocation7 + $0x8] sm:$0xff] }
 0x148   : > { %3299 = vmatpush1.bf16.msra.mxu1 %v3298_v58  ;;  %v1031_v58 = vld [vmem:[#allocation2 + $0x650] sm:$0xff] }
 0x149   : > { %3301 = vmatprep.subr.bf16.mxu1 %v3300_v10  ;;  %v3470_v3 = vpack.c.bf16 %v1031_v58, %v1029_v57  ;;  %v1163_v57 = vld [vmem:[#allocation2 + $0x6e0] sm:$0xff]  ;;  %v1165_v58 = vld [vmem:[#allocation2 + $0x6f0] sm:$0xff] }
 0x14a   : > { %3447 = vmatpush1.bf16.msra.mxu0 %v3446_v38 }
 0x14b   : > { %3449 = vmatprep.subr.bf16.mxu0 %v3448_v42  ;;  %v370_v38 = vpop.permute.xlu1 %369  ;;  %v4713_v42 = vpop.permute.xlu0 %1493 }
 0x14c   : > { %3303 = vmatpush1.bf16.msra.mxu1 %v3302_v44  ;;  %v377_v41 = vsel %vm375_vm4, %v4042_v0, %v370_v38  ;;  %v1037_v44 = vld [vmem:[#allocation2 + $0x680] sm:$0xff]  ;;  %v3624_v0 = vpack.c.bf16 %v1667_v20, %v1666_v19  ;;  %v1182_v19 = vld [vmem:[#allocation2 + $0x778] sm:$0xff] }
 0x14d   : > { %984 = vmatmul.mubr.f32.vlgmr.msra.gmra.mrb[0].mxu0 %v907_v61  ;;  %v1179_v20 = vld [vmem:[#allocation2 + $0x760] sm:$0xff] }
 0x14e   : > { %3451 = vmatpush1.bf16.msra.mxu0 %v3450_v62  ;;  %2768 = vmatprep.mubr.msk.f32.mxu0 %vm382_vm0, %v4656_v54  ;;  %v909_v54 = vsel %vm375_vm4, %v4665_v14, %v4663_v13  ;;  %v1025_v14 = vld [vmem:[#allocation2 + $0x620] sm:$0xff]  ;;  %v1034_v62 = vld [vmem:[#allocation2 + $0x668] sm:$0xff] }
 0x14f   : > { %3453 = vmatprep.subr.bf16.mxu0 %v3452_v30  ;;  %454 = vmatmul.mubr.f32.vlgmr.msra.gmra.mrb[0].mxu1 %v376_v1  ;;  %v3466_v48 = vpack.c.bf16 %v1027_v43, %v1025_v14  ;;  %v4715_v51 = vpop.permute.xlu1 %1497  ;;  %v4717_v61 = vpop.permute.xlu0 %1495  ;;  %v3472_v5 = vpack.c.bf16 %v1036_v63, %v1034_v62  ;;  %v1669_v1 = vld [vmem:[#allocation7 + $0x18] sm:$0xff]  ;;  %v1161_v14 = vld [vmem:[#allocation2 + $0x6d0] sm:$0xff]  ;;  %v1164_v43 = vld [vmem:[#allocation2 + $0x6e8] sm:$0xff] }
 0x150   : > { %2756 = vmatprep.mubr.msk.f32.mxu1 %vm382_vm0, %v370_v38  ;;  %3625 = vmatprep.subr.bf16.mxu1 %v3624_v0  ;;  %v1168_v62 = vld [vmem:[#allocation2 + $0x708] sm:$0xff]  ;;  %v1170_v63 = vld [vmem:[#allocation2 + $0x718] sm:$0xff] }
 0x151   : > { %990 = vmatmul.mubr.f32.gmra.mrb[2].mxu0 %v908_v29  ;;  %v1042_v29 = vld [vmem:[#allocation2 + $0x6a8] sm:$0xff]  ;;  %3627 = vmatpush3.bf16.msra.mxu1 %v3624_v0 }
 0x152   : > { %3455 = vmatpush1.bf16.msra.mxu0 %v3454_v45  ;;  %2769 = vmatprep.mubr.msk.f32.mxu0 %vm382_vm0, %v4663_v13  ;;  %v3464_v13 = vpack.c.bf16 %v1028_v15, %v1026_v35  ;;  %v1039_v45 = vld [vmem:[#allocation2 + $0x690] sm:$0xff]  ;;  %v1160_v35 = vld [vmem:[#allocation2 + $0x6c8] sm:$0xff]  ;;  %v1162_v15 = vld [vmem:[#allocation2 + $0x6d8] sm:$0xff] }
 0x153   : > { %3457 = vmatprep.subr.bf16.mxu0 %v3456_v31  ;;  %460 = vmatmul.mubr.f32.gmra.mrb[2].mxu1 %v377_v41  ;;  %v374_v30 = vpop.permute.xlu1 %373  ;;  %v372_v10 = vpop.permute.xlu0 %371  ;;  %v1044_v31 = vld [vmem:[#allocation2 + $0x6b8] sm:$0xff]  ;;  %v3478_v25 = vpack.c.bf16 %v1039_v45, %v1037_v44  ;;  %v3632_v41 = vpack.c.bf16 %v1671_v34, %v1670_v33  ;;  %v1175_v45 = vld [vmem:[#allocation2 + $0x740] sm:$0xff] }
 0x154   : > { %2757 = vmatprep.mubr.msk.f32.mxu1 %vm382_vm0, %v374_v30  ;;  %v378_v12 = vsel %vm375_vm4, %v372_v10, %v374_v30  ;;  %v1058_v30 = vsel %vm610_vm3, %v4676_v53, %v4674_v52  ;;  %v3496_v10 = vpack.c.bf16 %v1174_v7, %v1172_v6  ;;  %v1176_v53 = vld [vmem:[#allocation2 + $0x748] sm:$0xff]  ;;  %v1316_v6 = vld [vmem:[#allocation2 + $0x838] sm:$0xff] }
 0x155   : > { %996 = vmatmul.mubr.f32.gmra.mrb[4].mxu0 %v909_v54  ;;  %v1043_v54 = vld [vmem:[#allocation2 + $0x6b0] sm:$0xff] }
 0x156   : > { %3459 = vmatpush1.bf16.msra.mxu0 %v3458_v2  ;;  %2770 = vmatprep.mubr.msk.f32.mxu0 %vm382_vm0, %v4670_v36  ;;  %v3480_v2 = vpack.c.bf16 %v1044_v31, %v1042_v29  ;;  %v3482_v38 = vpack.c.bf16 %v1043_v54, %v1041_v28  ;;  %v3492_v36 = vpack.c.bf16 %v1170_v63, %v1168_v62  ;;  %v1177_v29 = vld [vmem:[#allocation2 + $0x750] sm:$0xff]  ;;  %v1180_v31 = vld [vmem:[#allocation2 + $0x768] sm:$0xff]  ;;  %v1186_v28 = vld [vmem:[#allocation2 + $0x798] sm:$0xff] }
 0x157   : > { %3461 = vmatprep.subr.bf16.mxu0 %v3460_v55  ;;  %466 = vmatmul.mubr.f32.gmra.mrb[4].mxu1 %v378_v12  ;;  %v3628_v55 = vpack.c.bf16 %v1669_v1, %v1668_v22  ;;  %v1178_v12 = vld [vmem:[#allocation2 + $0x758] sm:$0xff]  ;;  %v3504_v16 = vpack.c.bf16 %v1182_v19, %v1180_v31  ;;  %v1181_v22 = vld [vmem:[#allocation2 + $0x770] sm:$0xff]  ;;  %v1188_v54 = vld [vmem:[#allocation2 + $0x7a8] sm:$0xff] }
 0x158   : > { %v3500_v44 = vpack.c.bf16 %v1178_v12, %v1176_v53  ;;  %v3506_v0 = vpack.c.bf16 %v1181_v22, %v1179_v20  ;;  %v1310_v62 = vld [vmem:[#allocation2 + $0x808] sm:$0xff]  ;;  %v1312_v63 = vld [vmem:[#allocation2 + $0x818] sm:$0xff]  ;;  %v1317_v12 = vld [vmem:[#allocation2 + $0x840] sm:$0xff] }
 0x159   : > { %3629 = vmatprep.subr.bf16.mxu1 %v3628_v55  ;;  %v1323_v31 = vld [vmem:[#allocation2 + $0x870] sm:$0xff]  ;;  %v1326_v19 = vld [vmem:[#allocation2 + $0x888] sm:$0xff]  ;;  %v1325_v20 = vld [vmem:[#allocation2 + $0x880] sm:$0xff] }
 0x15a   : > { %3463 = vmatpush1.bf16.msra.mxu0 %v3462_v18  ;;  %v3484_v18 = vpack.c.bf16 %v1162_v15, %v1160_v35  ;;  %3631 = vmatpush3.bf16.msra.mxu1 %v3628_v55  ;;  %v1190_v55 = vld [vmem:[#allocation2 + $0x7b8] sm:$0xff]  ;;  %v1187_v35 = vld [vmem:[#allocation2 + $0x7a0] sm:$0xff]  ;;  %v1189_v15 = vld [vmem:[#allocation2 + $0x7b0] sm:$0xff] }
 0x15b   : > { %3465 = vmatprep.subr.bf16.mxu0 %v3464_v13  ;;  %v1159_v13 = vld [vmem:[#allocation2 + $0x6c0] sm:$0xff]  ;;  %3633 = vmatprep.subr.bf16.mxu1 %v3632_v41  ;;  %v3512_v34 = vpack.c.bf16 %v1190_v55, %v1188_v54  ;;  %v1327_v22 = vld [vmem:[#allocation2 + $0x890] sm:$0xff] }
 0x15c   : > { %v1331_v54 = vld [vmem:[#allocation2 + $0x8b0] sm:$0xff] }
 0x15e   : > { %3467 = vmatpush1.bf16.msra.mxu0 %v3466_v48  ;;  %v3486_v48 = vpack.c.bf16 %v1161_v14, %v1159_v13  ;;  %3635 = vmatpush3.bf16.msra.mxu1 %v3632_v41  ;;  %v1194_v41 = vld [vmem:[#allocation2 + $0x7d8] sm:$0xff]  ;;  %v1191_v14 = vld [vmem:[#allocation2 + $0x7c0] sm:$0xff] }
 0x15f   : > { %3469 = vmatprep.subr.bf16.mxu0 %v3468_v56  ;;  %v3488_v56 = vpack.c.bf16 %v1166_v46, %v1164_v43  ;;  %v1193_v43 = vld [vmem:[#allocation2 + $0x7d0] sm:$0xff]  ;;  %v1306_v46 = vld [vmem:[#allocation2 + $0x7e8] sm:$0xff] }
 0x162   : > { %3471 = vmatpush1.bf16.msra.mxu0 %v3470_v3  ;;  %v3490_v3 = vpack.c.bf16 %v1165_v58, %v1163_v57  ;;  %v1305_v57 = vld [vmem:[#allocation2 + $0x7e0] sm:$0xff]  ;;  %v1307_v58 = vld [vmem:[#allocation2 + $0x7f0] sm:$0xff] }
 0x163   : > { %3473 = vmatprep.subr.bf16.mxu0 %v3472_v5  ;;  %v1169_v5 = vld [vmem:[#allocation2 + $0x710] sm:$0xff] }
 0x164   : > { %v3494_v39 = vpack.c.bf16 %v1169_v5, %v1167_v37  ;;  %v1311_v37 = vld [vmem:[#allocation2 + $0x810] sm:$0xff]  ;;  %v1314_v5 = vld [vmem:[#allocation2 + $0x828] sm:$0xff] }
 0x166   : > { %3475 = vmatpush1.bf16.msra.mxu0 %v3474_v11  ;;  %v1171_v11 = vld [vmem:[#allocation2 + $0x720] sm:$0xff] }
 0x167   : > { %3477 = vmatprep.subr.bf16.mxu0 %v3476_v17 }
 0x16a   : > { %3479 = vmatpush1.bf16.msra.mxu0 %v3478_v25  ;;  %v1184_v25 = vld [vmem:[#allocation2 + $0x788] sm:$0xff] }
 0x16b   : > { %3481 = vmatprep.subr.bf16.mxu0 %v3480_v2  ;;  %v3508_v1 = vpack.c.bf16 %v1186_v28, %v1184_v25  ;;  %v1183_v2 = vld [vmem:[#allocation2 + $0x780] sm:$0xff]  ;;  %v1330_v25 = vld [vmem:[#allocation2 + $0x8a8] sm:$0xff]  ;;  %v1332_v28 = vld [vmem:[#allocation2 + $0x8b8] sm:$0xff] }
 0x16e   : > { %3483 = vmatpush1.bf16.msra.mxu0 %v3482_v38  ;;  %v1192_v38 = vld [vmem:[#allocation2 + $0x7c8] sm:$0xff] }
 0x16f   : > { %3485 = vmatprep.subr.bf16.mxu0 %v3484_v18  ;;  %v3514_v18 = vpack.c.bf16 %v1189_v15, %v1187_v35  ;;  %v3516_v13 = vpack.c.bf16 %v1194_v41, %v1192_v38  ;;  %v1333_v15 = vld [vmem:[#allocation2 + $0x8c0] sm:$0xff]  ;;  %v1335_v38 = vld [vmem:[#allocation2 + $0x8d0] sm:$0xff] }
 0x171   : > { %1134 = vmatmul.mubr.f32.vlgmr.msra.gmra.mrb[0].mxu0 %v1057_v47  ;;  %v1308_v47 = vld [vmem:[#allocation2 + $0x7f8] sm:$0xff] }
 0x172   : > { %3487 = vmatpush1.bf16.msra.mxu0 %v3486_v48  ;;  %2771 = vmatprep.mubr.msk.f32.mxu0 %vm382_vm0, %v4674_v52  ;;  %v1173_v52 = vld [vmem:[#allocation2 + $0x730] sm:$0xff]  ;;  %v3518_v48 = vpack.c.bf16 %v1193_v43, %v1191_v14  ;;  %v1338_v43 = vld [vmem:[#allocation2 + $0x8e8] sm:$0xff] }
 0x173   : > { %3489 = vmatprep.subr.bf16.mxu0 %v3488_v56  ;;  %v3498_v17 = vpack.c.bf16 %v1173_v52, %v1171_v11  ;;  %v3520_v56 = vpack.c.bf16 %v1308_v47, %v1306_v46  ;;  %v1318_v11 = vld [vmem:[#allocation2 + $0x848] sm:$0xff]  ;;  %v1320_v52 = vld [vmem:[#allocation2 + $0x858] sm:$0xff] }
 0x174   : > { %v1676_v14 = vld [vmem:[#allocation7 + $0x50] sm:$0xff] }
 0x175   : > { %1140 = vmatmul.mubr.f32.gmra.mrb[2].mxu0 %v1058_v30  ;;  %v3524_v30 = vpack.c.bf16 %v1312_v63, %v1310_v62  ;;  %v1340_v46 = vld [vmem:[#allocation2 + $0x8f8] sm:$0xff]  ;;  %v1337_v62 = vld [vmem:[#allocation2 + $0x8e0] sm:$0xff]  ;;  %v1339_v63 = vld [vmem:[#allocation2 + $0x8f0] sm:$0xff] }
 0x176   : > { %3491 = vmatpush1.bf16.msra.mxu0 %v3490_v3  ;;  %2772 = vmatprep.mubr.msk.f32.mxu0 %vm382_vm0, %v4678_v40  ;;  %v3502_v40 = vpack.c.bf16 %v1177_v29, %v1175_v45  ;;  %v3522_v3 = vpack.c.bf16 %v1307_v58, %v1305_v57  ;;  %v1324_v45 = vld [vmem:[#allocation2 + $0x878] sm:$0xff]  ;;  %v1321_v29 = vld [vmem:[#allocation2 + $0x860] sm:$0xff]  ;;  %v3550_v57 = vpack.c.bf16 %v1335_v38, %v1333_v15  ;;  %v1481_v38 = vld [vmem:[#allocation2 + $0x9d0] sm:$0xff] }
 0x177   : > { %3493 = vmatprep.subr.bf16.mxu0 %v3492_v36  ;;  %v1309_v36 = vld [vmem:[#allocation2 + $0x800] sm:$0xff]  ;;  %v3552_v58 = vpack.c.bf16 %v1340_v46, %v1338_v43  ;;  %v1485_v46 = vld [vmem:[#allocation2 + $0x9f0] sm:$0xff] }
 0x178   : > { %v3526_v7 = vpack.c.bf16 %v1311_v37, %v1309_v36  ;;  %v3554_v36 = vpack.c.bf16 %v1339_v63, %v1337_v62  ;;  %v1479_v15 = vld [vmem:[#allocation2 + $0x9c0] sm:$0xff]  ;;  %v1489_v62 = vld [vmem:[#allocation2 + $0xa10] sm:$0xff] }
 0x179   : > { %1146 = vmatmul.mubr.f32.gmra.mrb[4].mxu0 %v1059_v8  ;;  %v1313_v8 = vld [vmem:[#allocation2 + $0x820] sm:$0xff] }
 0x17a   : > { %3495 = vmatpush1.bf16.msra.mxu0 %v3494_v39  ;;  %2773 = vmatprep.mubr.msk.f32.mxu0 %vm382_vm0, %v4588_v59  ;;  %v1185_v59 = vld [vmem:[#allocation2 + $0x790] sm:$0xff]  ;;  %v3528_v39 = vpack.c.bf16 %v1316_v6, %v1314_v5  ;;  %v1455_v5 = vld [vmem:[#allocation2 + $0x900] sm:$0xff] }
 0x17b   : > { %3497 = vmatprep.subr.bf16.mxu0 %v3496_v10  ;;  %v3510_v33 = vpack.c.bf16 %v1185_v59, %v1183_v2  ;;  %v1315_v10 = vld [vmem:[#allocation2 + $0x830] sm:$0xff]  ;;  %v3544_v2 = vpack.c.bf16 %v1332_v28, %v1330_v25  ;;  %v1329_v59 = vld [vmem:[#allocation2 + $0x8a0] sm:$0xff] }
 0x17c   : > { %v3530_v53 = vpack.c.bf16 %v1315_v10, %v1313_v8  ;;  %v3546_v35 = vpack.c.bf16 %v1331_v54, %v1329_v59  ;;  %v1457_v6 = vld [vmem:[#allocation2 + $0x910] sm:$0xff]  ;;  %v1353_v8 = vsel %vm375_vm4, %v4684_v32, %v4682_v4  ;;  %v1471_v28 = vld [vmem:[#allocation2 + $0x980] sm:$0xff] }
 0x17d   : > { %v3558_v10 = vpack.c.bf16 %v1457_v6, %v1455_v5  ;;  %v1475_v59 = vld [vmem:[#allocation2 + $0x9a0] sm:$0xff]  ;;  %v1477_v54 = vld [vmem:[#allocation2 + $0x9b0] sm:$0xff] }
 0x17e   : > { %3499 = vmatpush1.bf16.msra.mxu0 %v3498_v17  ;;  %v1319_v17 = vld [vmem:[#allocation2 + $0x850] sm:$0xff]  ;;  %v1483_v43 = vld [vmem:[#allocation2 + $0x9e0] sm:$0xff] }
 0x17f   : > { %3501 = vmatprep.subr.bf16.mxu0 %v3500_v44  ;;  %v1322_v44 = vld [vmem:[#allocation2 + $0x868] sm:$0xff] }
 0x182   : > { %3503 = vmatpush1.bf16.msra.mxu0 %v3502_v40  ;;  %v1328_v40 = vld [vmem:[#allocation2 + $0x898] sm:$0xff] }
 0x183   : > { %3505 = vmatprep.subr.bf16.mxu0 %v3504_v16  ;;  %v3540_v16 = vpack.c.bf16 %v1328_v40, %v1326_v19 }
 0x186   : > { %3507 = vmatpush1.bf16.msra.mxu0 %v3506_v0  ;;  %v1672_v0 = vld [vmem:[#allocation7 + $0x30] sm:$0xff] }
 0x187   : > { %3509 = vmatprep.subr.bf16.mxu0 %v3508_v1  ;;  %v1673_v1 = vld [vmem:[#allocation7 + $0x38] sm:$0xff] }
 0x188   : > { %v3636_v55 = vpack.c.bf16 %v1673_v1, %v1672_v0  ;;  %v1476_v0 = vld [vmem:[#allocation2 + $0x9a8] sm:$0xff]  ;;  %v1478_v1 = vld [vmem:[#allocation2 + $0x9b8] sm:$0xff] }
 0x18a   : > { %3511 = vmatpush1.bf16.msra.mxu0 %v3510_v33  ;;  %v1334_v33 = vld [vmem:[#allocation2 + $0x8c8] sm:$0xff]  ;;  %3637 = vmatprep.subr.bf16.mxu1 %v3636_v55 }
 0x18b   : > { %3513 = vmatprep.subr.bf16.mxu0 %v3512_v34  ;;  %v1336_v34 = vld [vmem:[#allocation2 + $0x8d8] sm:$0xff]  ;;  %3639 = vmatpush3.bf16.msra.mxu1 %v3636_v55  ;;  %v1480_v55 = vld [vmem:[#allocation2 + $0x9c8] sm:$0xff] }
 0x18c   : > { %v3548_v41 = vpack.c.bf16 %v1336_v34, %v1334_v33  ;;  %v1482_v33 = vld [vmem:[#allocation2 + $0x9d8] sm:$0xff]  ;;  %v3578_v34 = vpack.c.bf16 %v1477_v54, %v1475_v59 }
 0x18d   : > { %v1689_v59 = vld [vmem:[#allocation7 + $0xb0] sm:$0xff]  ;;  %v1690_v54 = vld [vmem:[#allocation7 + $0xb8] sm:$0xff] }
 0x18e   : > { %3515 = vmatpush1.bf16.msra.mxu0 %v3514_v18  ;;  %v1674_v18 = vld [vmem:[#allocation7 + $0x40] sm:$0xff] }
 0x18f   : > { %3517 = vmatprep.subr.bf16.mxu0 %v3516_v13  ;;  %v1675_v13 = vld [vmem:[#allocation7 + $0x48] sm:$0xff] }
 0x190   : > { %v3640_v47 = vpack.c.bf16 %v1675_v13, %v1674_v18  ;;  %v1486_v18 = vld [vmem:[#allocation2 + $0x9f8] sm:$0xff]  ;;  %v3582_v13 = vpack.c.bf16 %v1481_v38, %v1479_v15 }
 0x191   : > { %v1868_v38 = vld [vmem:[#allocation7 + $0x110] sm:$0xff] }
 0x192   : > { %3519 = vmatpush1.bf16.msra.mxu0 %v3518_v48  ;;  %v1677_v48 = vld [vmem:[#allocation7 + $0x58] sm:$0xff]  ;;  %3641 = vmatprep.subr.bf16.mxu1 %v3640_v47 }
 0x193   : > { %3521 = vmatprep.subr.bf16.mxu0 %v3520_v56  ;;  %v3644_v56 = vpack.c.bf16 %v1677_v48, %v1676_v14  ;;  %3643 = vmatpush3.bf16.msra.mxu1 %v3640_v47  ;;  %v1488_v47 = vld [vmem:[#allocation2 + $0xa08] sm:$0xff]  ;;  %v1490_v48 = vld [vmem:[#allocation2 + $0xa18] sm:$0xff] }
 0x195   : > { %1280 = vmatmul.mubr.f32.vlgmr.msra.gmra.mrb[0].mxu0 %v4593_v60  ;;  %v3532_v60 = vpack.c.bf16 %v1320_v52, %v1318_v11  ;;  %3645 = vmatprep.subr.bf16.mxu1 %v3644_v56  ;;  %v4036_v11 = vunpack.i.l.bf16 %v4688_v50 }
 0x196   : > { %3523 = vmatpush1.bf16.msra.mxu0 %v3522_v3  ;;  %2774 = vmatprep.mubr.msk.f32.mxu0 %vm382_vm0, %v4611_v27  ;;  %v3534_v27 = vpack.c.bf16 %v1319_v17, %v1317_v12  ;;  %v1456_v3 = vld [vmem:[#allocation2 + $0x908] sm:$0xff]  ;;  %v1466_v17 = vld [vmem:[#allocation2 + $0x958] sm:$0xff] }
 0x197   : > { %3525 = vmatprep.subr.bf16.mxu0 %v3524_v30  ;;  %v1458_v30 = vld [vmem:[#allocation2 + $0x918] sm:$0xff]  ;;  %3647 = vmatpush3.bf16.msra.mxu1 %v3644_v56  ;;  %v1464_v12 = vld [vmem:[#allocation2 + $0x948] sm:$0xff]  ;;  %v3586_v56 = vpack.c.bf16 %v1485_v46, %v1483_v43 }
 0x198   : > { %v3556_v37 = vpack.c.bf16 %v1458_v30, %v1456_v3  ;;  %v3564_v32 = vpack.c.bf16 %v1466_v17, %v1464_v12  ;;  %v4763_v3 = vsel %vm610_vm3, %v4700_v26, %v4713_v42  ;;  %v4771_v30 = vsel %vm610_vm3, %v4717_v61, %v4715_v51  ;;  %v1681_v61 = vld [vmem:[#allocation7 + $0x78] sm:$0xff]  ;;  %v1867_v12 = vld [vmem:[#allocation7 + $0x108] sm:$0xff]  ;;  %v1870_v46 = vld [vmem:[#allocation7 + $0x120] sm:$0xff] }
 0x199   : > { %1286 = vmatmul.mubr.f32.gmra.mrb[2].mxu0 %v4605_v24  ;;  %v3536_v24 = vpack.c.bf16 %v1324_v45, %v1322_v44  ;;  %v4037_v45 = vunpack.i.h.bf16 %v4688_v50  ;;  %v1697_v43 = vld [vmem:[#allocation7 + $0xf0] sm:$0xff] }
 0x19a   : > { %3527 = vmatpush1.bf16.msra.mxu0 %v3526_v7  ;;  %2775 = vmatprep.mubr.msk.f32.mxu0 %vm382_vm0, %v4601_v23  ;;  %v3538_v23 = vpack.c.bf16 %v1323_v31, %v1321_v29  ;;  %v1460_v7 = vld [vmem:[#allocation2 + $0x928] sm:$0xff]  ;;  %v1470_v31 = vld [vmem:[#allocation2 + $0x978] sm:$0xff] }
 0x19b   : > { %3529 = vmatprep.subr.bf16.mxu0 %v3528_v39  ;;  %v1462_v39 = vld [vmem:[#allocation2 + $0x938] sm:$0xff]  ;;  %v1468_v29 = vld [vmem:[#allocation2 + $0x968] sm:$0xff]  ;;  %v1355_v50 = vsel %vm375_vm4, %v4037_v45, %v4693_v9 }
 0x19c   : > { %v3560_v52 = vpack.c.bf16 %v1462_v39, %v1460_v7  ;;  %v3568_v40 = vpack.c.bf16 %v1470_v31, %v1468_v29  ;;  %v1678_v39 = vld [vmem:[#allocation7 + $0x60] sm:$0xff]  ;;  %v1684_v45 = vld [vmem:[#allocation7 + $0x88] sm:$0xff]  ;;  %v1606_v29 = vlaneseq }
 0x19d   : > { %1292 = vmatmul.mubr.f32.gmra.mrb[4].mxu0 %v4598_v21  ;;  %v3542_v21 = vpack.c.bf16 %v1327_v22, %v1325_v20  ;;  %v1474_v20 = vld [vmem:[#allocation2 + $0x998] sm:$0xff] }
 0x19e   : > { %3531 = vmatpush1.bf16.msra.mxu0 %v3530_v53  ;;  %2776 = vmatprep.mubr.msk.f32.mxu0 %vm382_vm0, %v4682_v4  ;;  %v1459_v53 = vld [vmem:[#allocation2 + $0x920] sm:$0xff]  ;;  %v1354_v4 = vsel %vm375_vm4, %v4036_v11, %v4686_v49  ;;  %v1607_v31 = vshrl.u32 %v1606_v29, 7 }
 0x19f   : > { %3533 = vmatprep.subr.bf16.mxu0 %v3532_v60  ;;  %v1461_v60 = vld [vmem:[#allocation2 + $0x930] sm:$0xff] }
 0x1a0   : > { %v3562_v44 = vpack.c.bf16 %v1461_v60, %v1459_v53  ;;  %v1866_v60 = vld [vmem:[#allocation7 + $0x100] sm:$0xff]  ;;  %vm1635_vm6 = vcmp.ge.s32.totalorder %v1607_v31, 1 }
 0x1a1   : > { %v4782_v17 = vpack.c.bf16 %v1867_v12, %v1866_v60 }
 0x1a2   : > { %3535 = vmatpush1.bf16.msra.mxu0 %v3534_v27  ;;  %v1463_v27 = vld [vmem:[#allocation2 + $0x940] sm:$0xff] }
 0x1a3   : > { %3537 = vmatprep.subr.bf16.mxu0 %v3536_v24  ;;  %v1465_v24 = vld [vmem:[#allocation2 + $0x950] sm:$0xff] }
 0x1a4   : > { %v3566_v19 = vpack.c.bf16 %v1465_v24, %v1463_v27  ;;  %v1686_v27 = vld [vmem:[#allocation7 + $0x98] sm:$0xff] }
 0x1a6   : > { %3539 = vmatpush1.bf16.msra.mxu0 %v3538_v23  ;;  %v1467_v23 = vld [vmem:[#allocation2 + $0x960] sm:$0xff] }
 0x1a7   : > { %3541 = vmatprep.subr.bf16.mxu0 %v3540_v16  ;;  %v1469_v16 = vld [vmem:[#allocation2 + $0x970] sm:$0xff] }
 0x1a8   : > { %v3570_v22 = vpack.c.bf16 %v1469_v16, %v1467_v23  ;;  %v1612_v23 = vsub.s32 1, %v1607_v31 }
 0x1aa   : > { %3543 = vmatpush1.bf16.msra.mxu0 %v3542_v21  ;;  %v1473_v21 = vld [vmem:[#allocation2 + $0x990] sm:$0xff] }
 0x1ab   : > { %3545 = vmatprep.subr.bf16.mxu0 %v3544_v2  ;;  %v3576_v2 = vpack.c.bf16 %v1478_v1, %v1476_v0 }
 0x1ae   : > { %3547 = vmatpush1.bf16.msra.mxu0 %v3546_v35  ;;  %v3580_v35 = vpack.c.bf16 %v1482_v33, %v1480_v55  ;;  %v3604_v33 = vpack.c.bf16 %v1690_v54, %v1689_v59 }
 0x1af   : > { %3549 = vmatprep.subr.bf16.mxu0 %v3548_v41  ;;  %v1484_v41 = vld [vmem:[#allocation2 + $0x9e8] sm:$0xff] }
 0x1b0   : > { %v3584_v14 = vpack.c.bf16 %v1486_v18, %v1484_v41  ;;  %v1869_v41 = vld [vmem:[#allocation7 + $0x118] sm:$0xff] }
 0x1b2   : > { %3551 = vmatpush1.bf16.msra.mxu0 %v3550_v57  ;;  %v3588_v57 = vpack.c.bf16 %v1490_v48, %v1488_v47  ;;  %v1871_v47 = vld [vmem:[#allocation7 + $0x128] sm:$0xff] }
 0x1b3   : > { %3553 = vmatprep.subr.bf16.mxu0 %v3552_v58  ;;  %v1487_v58 = vld [vmem:[#allocation2 + $0xa00] sm:$0xff] }
 0x1b4   : > { %v3590_v63 = vpack.c.bf16 %v1489_v62, %v1487_v58  ;;  %v1692_v58 = vld [vmem:[#allocation7 + $0xc8] sm:$0xff] }
 0x1b6   : > { %3555 = vmatpush1.bf16.msra.mxu0 %v3554_v36  ;;  %v1502_v36 = vpop.permute.xlu1 %1501 }
 0x1b7   : > { %3557 = vmatprep.subr.bf16.mxu0 %v3556_v37  ;;  %v1500_v37 = vpop.permute.xlu0 %1499 }
 0x1b8   : > { %v1505_v5 = vsel %vm610_vm3, %v1500_v37, %v1502_v36 }
 0x1b9   : > { %1430 = vmatmul.mubr.f32.vlgmr.msra.gmra.mrb[0].mxu0 %v1353_v8  ;;  %v1679_v8 = vld [vmem:[#allocation7 + $0x68] sm:$0xff] }
 0x1ba   : > { %3559 = vmatpush1.bf16.msra.mxu0 %v3558_v10  ;;  %2777 = vmatprep.mubr.msk.f32.mxu0 %vm382_vm0, %v4686_v49  ;;  %v1472_v49 = vld [vmem:[#allocation2 + $0x988] sm:$0xff]  ;;  %v3648_v10 = vpack.c.bf16 %v1679_v8, %v1678_v39 }
 0x1bb   : > { %3561 = vmatprep.subr.bf16.mxu0 %v3560_v52  ;;  %v3572_v25 = vpack.c.bf16 %v1474_v20, %v1472_v49  ;;  %v1687_v49 = vld [vmem:[#allocation7 + $0xa0] sm:$0xff]  ;;  %v1688_v20 = vld [vmem:[#allocation7 + $0xa8] sm:$0xff] }
 0x1bc   : > { %3649 = vmatprep.subr.bf16.mxu1 %v3648_v10 }
 0x1bd   : > { %1436 = vmatmul.mubr.f32.gmra.mrb[2].mxu0 %v1354_v4  ;;  %3651 = vmatpush3.bf16.msra.mxu1 %v3648_v10 }
 0x1be   : > { %3563 = vmatpush1.bf16.msra.mxu0 %v3562_v44  ;;  %2778 = vmatprep.mubr.msk.f32.mxu0 %vm382_vm0, %v4693_v9  ;;  %v3574_v9 = vpack.c.bf16 %v1473_v21, %v1471_v28  ;;  %v1683_v44 = vld [vmem:[#allocation7 + $0x80] sm:$0xff] }
 0x1bf   : > { %3565 = vmatprep.subr.bf16.mxu0 %v3564_v32  ;;  %v3592_v4 = vpack.c.bf16 %v1684_v45, %v1683_v44  ;;  %v1685_v32 = vld [vmem:[#allocation7 + $0x90] sm:$0xff]  ;;  %v1694_v45 = vld [vmem:[#allocation7 + $0xd8] sm:$0xff] }
 0x1c0   : > { %v3596_v24 = vpack.c.bf16 %v1686_v27, %v1685_v32  ;;  %v1693_v44 = vld [vmem:[#allocation7 + $0xd0] sm:$0xff] }
 0x1c1   : > { %1442 = vmatmul.mubr.f32.gmra.mrb[4].mxu0 %v1355_v50  ;;  %v1608_v50 = vsub.s32 0, %v1607_v31  ;;  %v3612_v27 = vpack.c.bf16 %v1694_v45, %v1693_v44  ;;  %v1974_v45 = vld [vmem:[#allocation7 + $0x190] sm:$0xff] }
 0x1c2   : > { %3567 = vmatpush1.bf16.msra.mxu0 %v3566_v19  ;;  %2779 = vmatprep.mubr.msk.f32.mxu0 %vm382_vm0, %v4713_v42  ;;  %v4785_v19 = vand.u32 127, %v1606_v29 }
 0x1c3   : > { %3569 = vmatprep.subr.bf16.mxu0 %v3568_v40  ;;  %v1604_v40 = vld [vmem:[#allocation5] sm:$0x3] }
 0x1c4   : > { %v4788_v16 = vadd.s32 128, %v4785_v19  ;;  %v4790_v21 = vrot.slane %v1604_v40, %v1612_v23  ;;  %vm1644_vm5 = vcmp.ge.s32.totalorder %v4785_v19, 8 }
 0x1c5   : > { %vm4798_vm8 = vmand %vm1635_vm6, %vm1644_vm5 }
 0x1c6   : > { %3571 = vmatpush1.bf16.msra.mxu0 %v3570_v22  ;;  %v1609_v22 = vrot.slane %v1604_v40, %v1608_v50  ;;  %vm1653_vm7 = vcmp.lt.s32.totalorder %v4788_v16, 136 }
 0x1c7   : > { %3573 = vmatprep.subr.bf16.mxu0 %v3572_v25  ;;  %v3600_v25 = vpack.c.bf16 %v1688_v20, %v1687_v49  ;;  %vm4805_vm9 = vmand %vm1635_vm6, %vm1653_vm7  ;;  %v1979_v20 = vld [vmem:[#allocation7 + $0x1b8] sm:$0xff] }
 0x1ca   : > { %3575 = vmatpush1.bf16.msra.mxu0 %v3574_v9 }
 0x1cb   : > { %3577 = vmatprep.subr.bf16.mxu0 %v3576_v2  ;;  %v1631_v2 = vadd.s32 16, %v1607_v31  ;;  %v1976_v31 = vld [vmem:[#allocation7 + $0x1a0] sm:$0xff] }
 0x1cd   : > { %vm1640_vm10 = vcmp.lt.s32.totalorder %v1631_v2, 17  ;;  %v1696_v2 = vld [vmem:[#allocation7 + $0xe8] sm:$0xff] }
 0x1ce   : > { %3579 = vmatpush1.bf16.msra.mxu0 %v3578_v34  ;;  %vm4834_vm11 = vmand %vm1640_vm10, %vm1644_vm5 }
 0x1cf   : > { %3581 = vmatprep.subr.bf16.mxu0 %v3580_v35  ;;  %vm4843_vm12 = vmand %vm1640_vm10, %vm1653_vm7 }
 0x1d2   : > { %3583 = vmatpush1.bf16.msra.mxu0 %v3582_v13 }
 0x1d3   : > { %3585 = vmatprep.subr.bf16.mxu0 %v3584_v14 }
 0x1d6   : > { %3587 = vmatpush1.bf16.msra.mxu0 %v3586_v56 }
 0x1d7   : > { %3589 = vmatprep.subr.bf16.mxu0 %v3588_v57  ;;  %v1691_v57 = vld [vmem:[#allocation7 + $0xc0] sm:$0xff] }
 0x1d8   : > { %v3608_v37 = vpack.c.bf16 %v1692_v58, %v1691_v57 }
 0x1da   : > { %3591 = vmatpush1.bf16.msra.mxu0 %v3590_v63 }
 0x1db   : > { %3593 = vmatprep.subr.bf16.mxu0 %v3592_v4 }
 0x1dd   : > { %1580 = vmatmul.mubr.f32.vlgmr.msra.gmra.mrb[0].mxu0 %v4763_v3 }
 0x1de   : > { %2780 = vmatprep.mubr.msk.f32.mxu0 %vm382_vm0, %v4715_v51  ;;  %v1680_v51 = vld [vmem:[#allocation7 + $0x70] sm:$0xff]  ;;  %3595 = vmatpush3.bf16.msra.mxu0 %v3592_v4 }
 0x1df   : > { %v3652_v11 = vpack.c.bf16 %v1681_v61, %v1680_v51  ;;  %3597 = vmatprep.subr.bf16.mxu0 %v3596_v24 }
 0x1e1   : > { %1586 = vmatmul.mubr.f32.gmra.mrb[2].mxu0 %v4771_v30  ;;  %3653 = vmatprep.subr.bf16.mxu1 %v3652_v11 }
 0x1e2   : > { %2781 = vmatprep.mubr.msk.f32.mxu0 %vm382_vm0, %v1502_v36  ;;  %3655 = vmatpush3.bf16.msra.mxu1 %v3652_v11  ;;  %v3660_v36 = vpack.c.bf16 %v1869_v41, %v1868_v38  ;;  %v1874_v38 = vld [vmem:[#allocation7 + $0x140] sm:$0xff] }
 0x1e3   : > { %3657 = vmatprep.subr.bf16.mxu1 %v4782_v17  ;;  %3599 = vmatpush3.bf16.msra.mxu0 %v3596_v24 }
 0x1e4   : > { %3601 = vmatprep.subr.bf16.mxu0 %v3600_v25 }
 0x1e5   : > { %1592 = vmatmul.mubr.f32.gmra.mrb[4].mxu0 %v1505_v5 }
 0x1e7   : > { %3603 = vmatpush3.bf16.msra.mxu0 %v3600_v25 }
 0x1e8   : > { %3605 = vmatprep.subr.bf16.mxu0 %v3604_v33 }
 0x1eb   : > { %3607 = vmatpush3.bf16.msra.mxu0 %v3604_v33 }
 0x1ec   : > { %3609 = vmatprep.subr.bf16.mxu0 %v3608_v37 }
 0x1ef   : > { %3611 = vmatpush3.bf16.msra.mxu0 %v3608_v37 }
 0x1f0   : > { %3613 = vmatprep.subr.bf16.mxu0 %v3612_v27 }
 0x1f3   : > { %3615 = vmatpush3.bf16.msra.mxu0 %v3612_v27 }
 0x222   : > { %v455_v26 = vpop.f32.mrb[0].mxu1 }
 0x223   : > { %v457_v42 = vpop.f32.mrb[1].mxu1 }
 0x226   : > { %v461_v6 = vpop.f32.mrb[2].mxu1 }
 0x227   : > { %v4776_v7 = vpop.f32.mrb[3].mxu1 }
 0x22a   : > { %v4778_v52 = vpop.f32.mrb[4].mxu1 }
 0x22b   : > { %v4780_v53 = vpop.f32.mrb[5].mxu1 }
 0x2b0   : > { %v1581_v28 = vpop.f32.mrb[0].mxu0 }
 0x2b1   : > { %v3880_v0 = vadd.f32 %v1581_v28, %v455_v26  ;;  %v1583_v1 = vpop.f32.mrb[1].mxu0  ;;  %v1872_v28 = vld [vmem:[#allocation7 + $0x130] sm:$0xff] }
 0x2b2   : > { %v3881_v9 = vadd.f32 %v1583_v1, %v457_v42 }
 0x2b3   : > { %v1616_v55 = vadd.f32 %v3880_v0, %v1609_v22 }
 0x2b4   : > { %v1617_v34 = vadd.f32 %v3881_v9, %v4790_v21  ;;  %v1587_v35 = vpop.f32.mrb[2].mxu0  ;;  %v1695_v9 = vld [vmem:[#allocation7 + $0xe0] sm:$0xff] }
 0x2b5   : > { %v1622_v18 = vmax.f32 %v1616_v55, 0.0  ;;  %v3882_v13 = vadd.f32 %v1587_v35, %v461_v6  ;;  %v1589_v14 = vpop.f32.mrb[3].mxu0 }
 0x2b6   : > { %v1623_v48 = vmax.f32 %v1617_v34, 0.0  ;;  %v3883_v56 = vadd.f32 %v1589_v14, %v4776_v7  ;;  %v4817_v7 = vpack.c.bf16 %v1871_v47, %v1870_v46  ;;  %v3616_v14 = vpack.c.bf16 %v1696_v2, %v1695_v9  ;;  %v1698_v46 = vld [vmem:[#allocation7 + $0xf8] sm:$0xff] }
 0x2b7   : > { %v1618_v62 = vadd.f32 %v3882_v13, %v1609_v22  ;;  %v1660_v63 = vsel %vm4798_vm8, %v1622_v18, 0.0  ;;  %3020 = vmatprep.mubr.msk.f32.mxu1 %vm4798_vm8, %v1622_v18  ;;  %v1875_v13 = vld [vmem:[#allocation7 + $0x148] sm:$0xff]  ;;  %v3620_v57 = vpack.c.bf16 %v1698_v46, %v1697_v43  ;;  %v1983_v9 = vld [vmem:[#allocation7 + $0x1d8] sm:$0xff] }
 0x2b8   : > { %v1619_v5 = vadd.f32 %v3883_v56, %v4790_v21  ;;  %v1661_v26 = vsel %vm4805_vm9, %v1623_v48, 0.0  ;;  %v1989_v42 = vrot.slane %v1660_v63, 1  ;;  %v1593_v6 = vpop.f32.mrb[4].mxu0  ;;  %v2308_v8 = vrot.slane %v1660_v63, 2  ;;  %3617 = vmatprep.subr.bf16.mxu0 %v3616_v14  ;;  %v1987_v43 = vld [vmem:[#allocation7 + $0x1f8] sm:$0xff] }
 0x2b9   : > { %v1624_v39 = vmax.f32 %v1618_v62, 0.0  ;;  %v3884_v10 = vadd.f32 %v1593_v6, %v4778_v52  ;;  %v1595_v51 = vpop.f32.mrb[5].mxu0  ;;  %v4820_v61 = vpack.i.bf16 %v1661_v26, %v1660_v63  ;;  %v2091_v12 = vrot.slane %v1661_v26, 1  ;;  %v1876_v62 = vld [vmem:[#allocation7 + $0x150] sm:$0xff]  ;;  %v1877_v63 = vld [vmem:[#allocation7 + $0x158] sm:$0xff]  ;;  %3619 = vmatpush3.bf16.msra.mxu0 %v3616_v14 }
 0x2ba   : > { %v1625_v11 = vmax.f32 %v1619_v5, 0.0  ;;  %v3885_v60 = vadd.f32 %v1595_v51, %v4780_v53  ;;  %v2409_v52 = vrot.slane %v1661_v26, 2  ;;  %v3672_v58 = vpack.c.bf16 %v1875_v13, %v1874_v38  ;;  %3621 = vmatprep.subr.bf16.mxu0 %v3620_v57  ;;  %v1878_v5 = vld [vmem:[#allocation7 + $0x160] sm:$0xff]  ;;  %v1879_v26 = vld [vmem:[#allocation7 + $0x168] sm:$0xff]  ;;  %v1986_v14 = vld [vmem:[#allocation7 + $0x1f0] sm:$0xff] }
 0x2bb   : > { %v1662_v4 = vsel %vm1644_vm5, %v1624_v39, 0.0  ;;  %v1620_v32 = vadd.f32 %v3884_v10, %v1609_v22  ;;  %4044 = vrot.lane.b32.xlu0 %v4820_v61, %s4299_s14  ;;  %3021 = vmatmul.mubr.msk.f32.vlgmr.msra.gmra.mrb[6].mxu1 %vm1644_vm5, %v1624_v39  ;;  %v3676_v37 = vpack.c.bf16 %v1877_v63, %v1876_v62  ;;  %v3680_v6 = vpack.c.bf16 %v1879_v26, %v1878_v5  ;;  %v1881_v39 = vld [vmem:[#allocation7 + $0x178] sm:$0xff]  ;;  %v1972_v10 = vld [vmem:[#allocation7 + $0x180] sm:$0xff]  ;;  %v1973_v51 = vld [vmem:[#allocation7 + $0x188] sm:$0xff] }
 0x2bc   : > { %v1990_v24 = vrot.slane %v1662_v4, 1  ;;  %v2309_v29 = vrot.slane %v1662_v4, 2  ;;  %v1663_v53 = vsel %vm1653_vm7, %v1625_v11, 0.0  ;;  %v1621_v50 = vadd.f32 %v3885_v60, %v4790_v21  ;;  %3659 = vmatpush3.bf16.msra.mxu1 %v4782_v17  ;;  %v1873_v21 = vld [vmem:[#allocation7 + $0x138] sm:$0xff]  ;;  %v2079_v5 = vld [vmem:[#allocation7 + $0x228] sm:$0xff] }
 0x2bd   : > { %v2092_v40 = vrot.slane %v1663_v53, 1  ;;  %v2410_v23 = vrot.slane %v1663_v53, 2  ;;  %v1626_v49 = vmax.f32 %v1620_v32, 0.0  ;;  %v4847_v19 = vpack.i.bf16 %v1663_v53, %v1662_v4  ;;  %3661 = vmatprep.subr.bf16.mxu1 %v3660_v36  ;;  %3623 = vmatpush3.bf16.msra.mxu0 %v3620_v57  ;;  %v1975_v4 = vld [vmem:[#allocation7 + $0x198] sm:$0xff]  ;;  %v2076_v57 = vld [vmem:[#allocation7 + $0x210] sm:$0xff] }
 0x2be   : > { %v1627_v22 = vmax.f32 %v1621_v50, 0.0  ;;  %v4850_v25 = vsel %vm749_vm1, %v1989_v42, %v1990_v24  ;;  %v4853_v17 = vsel %vm1195_vm2, %v2308_v8, %v2309_v29  ;;  %v3668_v15 = vpack.c.bf16 %v1873_v21, %v1872_v28  ;;  %v1977_v50 = vld [vmem:[#allocation7 + $0x1a8] sm:$0xff]  ;;  %v1980_v28 = vld [vmem:[#allocation7 + $0x1c0] sm:$0xff] }
 0x2bf   : > { %v1664_v16 = vsel %vm4834_vm11, %v1626_v49, 0.0  ;;  %4049 = vrot.lane.b32.xlu1 %v4847_v19, %s4299_s14  ;;  %v2093_v0 = vsel %vm749_vm1, %v2091_v12, %v2092_v40  ;;  %v2411_v1 = vsel %vm1195_vm2, %v2409_v52, %v2410_v23  ;;  %v3688_v11 = vpack.c.bf16 %v1973_v51, %v1972_v10  ;;  %v1978_v49 = vld [vmem:[#allocation7 + $0x1b0] sm:$0xff]  ;;  %v1981_v21 = vld [vmem:[#allocation7 + $0x1c8] sm:$0xff] }
 0x2c0   : > { %v1992_v59 = vrot.slane %v1664_v16, 1  ;;  %v2311_v54 = vrot.slane %v1664_v16, 2  ;;  %v1665_v55 = vsel %vm4843_vm12, %v1627_v22, 0.0  ;;  %v4053_v33 = vpack.i.bf16 %v2093_v0, %v4850_v25  ;;  %3663 = vmatpush3.bf16.msra.mxu1 %v3660_v36  ;;  %v2083_v10 = vld [vmem:[#allocation7 + $0x248] sm:$0xff] }
 0x2c1   : > { %v2094_v34 = vrot.slane %v1665_v55, 1  ;;  %v2412_v35 = vrot.slane %v1665_v55, 2  ;;  %3665 = vmatprep.subr.bf16.mxu1 %v4817_v7  ;;  %v4073_v36 = vpack.i.bf16 %v2411_v1, %v4853_v17  ;;  %v3704_v16 = vpack.c.bf16 %v1981_v21, %v1980_v28  ;;  %v1982_v1 = vld [vmem:[#allocation7 + $0x1d0] sm:$0xff]  ;;  %v2190_v21 = vld [vmem:[#allocation7 + $0x2a0] sm:$0xff] }
 0x2c2   : > { %4054 = vrot.lane.b32.xlu0 %v4053_v33, %s4300_s15  ;;  %v4867_v41 = vsel %vm749_vm1, %v1990_v24, %v1992_v59  ;;  %v4870_v18 = vsel %vm1195_vm2, %v2309_v29, %v2311_v54  ;;  %v3692_v24 = vpack.c.bf16 %v1975_v4, %v1974_v45  ;;  %v3708_v54 = vpack.c.bf16 %v1983_v9, %v1982_v1  ;;  %v2088_v45 = vld [vmem:[#allocation7 + $0x270] sm:$0xff]  ;;  %v2089_v4 = vld [vmem:[#allocation7 + $0x278] sm:$0xff] }
 0x2c3   : > { %v2095_v47 = vsel %vm749_vm1, %v2092_v40, %v2094_v34  ;;  %v2413_v48 = vsel %vm1195_vm2, %v2410_v23, %v2412_v35  ;;  %v3696_v40 = vpack.c.bf16 %v1977_v50, %v1976_v31  ;;  %v1985_v34 = vld [vmem:[#allocation7 + $0x1e8] sm:$0xff]  ;;  %v3716_v46 = vpack.c.bf16 %v1987_v43, %v1986_v14  ;;  %v2188_v50 = vld [vmem:[#allocation7 + $0x290] sm:$0xff]  ;;  %v2201_v14 = vld [vmem:[#allocation7 + $0x2f8] sm:$0xff] }
 0x2c4   : > { %v4058_v56 = vpack.i.bf16 %v2095_v47, %v4867_v41  ;;  %3667 = vmatpush3.bf16.msra.mxu1 %v4817_v7  ;;  %v4078_v42 = vpack.i.bf16 %v2413_v48, %v4870_v18  ;;  %v1880_v7 = vld [vmem:[#allocation7 + $0x170] sm:$0xff]  ;;  %v2074_v47 = vld [vmem:[#allocation7 + $0x200] sm:$0xff]  ;;  %v2075_v48 = vld [vmem:[#allocation7 + $0x208] sm:$0xff] }
 0x2c5   : > { %3669 = vmatprep.subr.bf16.mxu1 %v3668_v15  ;;  %v3684_v8 = vpack.c.bf16 %v1881_v39, %v1880_v7  ;;  %v2081_v7 = vld [vmem:[#allocation7 + $0x238] sm:$0xff]  ;;  %v2192_v9 = vld [vmem:[#allocation7 + $0x2b0] sm:$0xff] }
 0x2c6   : > { %4064 = vrot.lane.b32.xlu0 %v4053_v33, %s4299_s14  ;;  %4059 = vrot.lane.b32.xlu1 %v4058_v56, %s4300_s15  ;;  %v1984_v33 = vld [vmem:[#allocation7 + $0x1e0] sm:$0xff] }
 0x2c7   : > { %v3712_v13 = vpack.c.bf16 %v1985_v34, %v1984_v33  ;;  %v2197_v33 = vld [vmem:[#allocation7 + $0x2d8] sm:$0xff] }
 0x2c8   : > { %3671 = vmatpush3.bf16.msra.mxu1 %v3668_v15 }
 0x2c9   : > { %3673 = vmatprep.subr.bf16.mxu1 %v3672_v58 }
 0x2ca   : > { %4074 = vrot.lane.b32.xlu0 %v4073_v36, %s4300_s15  ;;  %4069 = vrot.lane.b32.xlu1 %v4058_v56, %s4299_s14  ;;  %v3720_v56 = vpack.c.bf16 %v2075_v48, %v2074_v47  ;;  %v2293_v47 = vld [vmem:[#allocation7 + $0x308] sm:$0xff] }
 0x2cc   : > { %3675 = vmatpush3.bf16.msra.mxu1 %v3672_v58  ;;  %v2077_v58 = vld [vmem:[#allocation7 + $0x218] sm:$0xff] }
 0x2cd   : > { %3677 = vmatprep.subr.bf16.mxu1 %v3676_v37 }
 0x2ce   : > { %4084 = vrot.lane.b32.xlu0 %v4820_v61, %s4300_s15  ;;  %4079 = vrot.lane.b32.xlu1 %v4078_v42, %s4300_s15 }
 0x2d0   : > { %3679 = vmatpush3.bf16.msra.mxu1 %v3676_v37  ;;  %v2078_v37 = vld [vmem:[#allocation7 + $0x220] sm:$0xff] }
 0x2d1   : > { %3681 = vmatprep.subr.bf16.mxu1 %v3680_v6 }
 0x2d2   : > { %4094 = vrot.lane.b32.xlu0 %v4847_v19, %s4300_s15  ;;  %4089 = vrot.lane.b32.xlu1 %v4073_v36, %s4299_s14  ;;  %v3700_v19 = vpack.c.bf16 %v1979_v20, %v1978_v49  ;;  %v3724_v36 = vpack.c.bf16 %v2077_v58, %v2076_v57 }
 0x2d4   : > { %3683 = vmatpush3.bf16.msra.mxu1 %v3680_v6  ;;  %v2080_v6 = vld [vmem:[#allocation7 + $0x230] sm:$0xff] }
 0x2d5   : > { %3685 = vmatprep.subr.bf16.mxu1 %v3684_v8  ;;  %v3732_v39 = vpack.c.bf16 %v2081_v7, %v2080_v6  ;;  %v2298_v6 = vld [vmem:[#allocation7 + $0x330] sm:$0xff]  ;;  %v2299_v7 = vld [vmem:[#allocation7 + $0x338] sm:$0xff] }
 0x2d6   : > { %4099 = vrot.lane.b32.xlu1 %v4078_v42, %s4299_s14  ;;  %v3728_v42 = vpack.c.bf16 %v2079_v5, %v2078_v37  ;;  %v2296_v5 = vld [vmem:[#allocation7 + $0x320] sm:$0xff] }
 0x2d8   : > { %3687 = vmatpush3.bf16.msra.mxu1 %v3684_v8  ;;  %v2082_v8 = vld [vmem:[#allocation7 + $0x240] sm:$0xff] }
 0x2d9   : > { %3689 = vmatprep.subr.bf16.mxu1 %v3688_v11  ;;  %v3736_v51 = vpack.c.bf16 %v2083_v10, %v2082_v8  ;;  %v2300_v8 = vld [vmem:[#allocation7 + $0x340] sm:$0xff]  ;;  %v2301_v10 = vld [vmem:[#allocation7 + $0x348] sm:$0xff] }
 0x32d   : > { %v4045_v61 = vpop.permute.xlu0 %4044 }
 0x32e   : > { %v4047_v60 = vunpack.i.h.bf16 %v4045_v61  ;;  %v4046_v12 = vunpack.i.l.bf16 %v4045_v61  ;;  %v2085_v61 = vld [vmem:[#allocation7 + $0x258] sm:$0xff] }
 0x330   : > { %v1890_v44 = vsel %vm610_vm3, %v4046_v12, %v4047_v60  ;;  %v2086_v60 = vld [vmem:[#allocation7 + $0x260] sm:$0xff]  ;;  %v2087_v12 = vld [vmem:[#allocation7 + $0x268] sm:$0xff] }
 0x331   : > { %3055 = vmatprep.mubr.f32.mxu1 %v1890_v44  ;;  %v4050_v32 = vpop.permute.xlu1 %4049  ;;  %v3744_v44 = vpack.c.bf16 %v2087_v12, %v2086_v60  ;;  %v2304_v60 = vld [vmem:[#allocation7 + $0x360] sm:$0xff]  ;;  %v2305_v12 = vld [vmem:[#allocation7 + $0x368] sm:$0xff] }
 0x332   : > { %v4052_v52 = vunpack.i.h.bf16 %v4050_v32  ;;  %v4051_v27 = vunpack.i.l.bf16 %v4050_v32  ;;  %v3748_v32 = vpack.c.bf16 %v2089_v4, %v2088_v45  ;;  %v2307_v45 = vld [vmem:[#allocation7 + $0x378] sm:$0xff] }
 0x334   : > { %v4890_v29 = vpop.permute.xlu0 %4054  ;;  %v1891_v53 = vsel %vm610_vm3, %v4051_v27, %v4052_v52  ;;  %v2186_v52 = vld [vmem:[#allocation7 + $0x280] sm:$0xff]  ;;  %v2187_v27 = vld [vmem:[#allocation7 + $0x288] sm:$0xff] }
 0x335   : > { %3056 = vmatmul.mubr.f32.vlgmr.msra.gmra.mrb[6].mxu1 %v1891_v53  ;;  %v4057_v62 = vunpack.i.h.bf16 %v4890_v29  ;;  %v4056_v63 = vunpack.i.l.bf16 %v4890_v29  ;;  %v3752_v29 = vpack.c.bf16 %v2187_v27, %v2186_v52  ;;  %v2394_v52 = vld [vmem:[#allocation7 + $0x388] sm:$0xff] }
 0x336   : > { %3691 = vmatpush3.bf16.msra.mxu1 %v3688_v11  ;;  %3090 = vmatprep.mubr.f32.mxu1 %v4850_v25  ;;  %v2084_v11 = vld [vmem:[#allocation7 + $0x250] sm:$0xff] }
 0x337   : > { %3693 = vmatprep.subr.bf16.mxu1 %v3692_v24  ;;  %v2104_v26 = vsel %vm375_vm4, %v4056_v63, %v4057_v62  ;;  %v2294_v62 = vld [vmem:[#allocation7 + $0x310] sm:$0xff]  ;;  %v2295_v63 = vld [vmem:[#allocation7 + $0x318] sm:$0xff] }
 0x338   : > { %v4894_v23 = vpop.permute.xlu0 %4064 }
 0x339   : > { %v4067_v49 = vunpack.i.h.bf16 %v4894_v23  ;;  %v4066_v20 = vunpack.i.l.bf16 %v4894_v23  ;;  %v2194_v23 = vld [vmem:[#allocation7 + $0x2c0] sm:$0xff] }
 0x33a   : > { %3695 = vmatpush3.bf16.msra.mxu1 %v3692_v24  ;;  %v4060_v24 = vpop.permute.xlu1 %4059 }
 0x33b   : > { %3697 = vmatprep.subr.bf16.mxu1 %v3696_v40  ;;  %v4062_v53 = vunpack.i.h.bf16 %v4060_v24  ;;  %v4061_v31 = vunpack.i.l.bf16 %v4060_v24  ;;  %v2395_v24 = vld [vmem:[#allocation7 + $0x390] sm:$0xff] }
 0x33c   : > { %v4896_v22 = vpop.permute.xlu0 %4074 }
 0x33d   : > { %v2105_v28 = vsel %vm375_vm4, %v4061_v31, %v4062_v53  ;;  %v4077_v53 = vunpack.i.h.bf16 %v4896_v22  ;;  %v4076_v31 = vunpack.i.l.bf16 %v4896_v22  ;;  %v2402_v22 = vld [vmem:[#allocation7 + $0x3c8] sm:$0xff] }
 0x33e   : > { %3699 = vmatpush3.bf16.msra.mxu1 %v3696_v40  ;;  %v2189_v40 = vld [vmem:[#allocation7 + $0x298] sm:$0xff]  ;;  %v4070_v48 = vpop.permute.xlu1 %4069 }
 0x33f   : > { %3701 = vmatprep.subr.bf16.mxu1 %v3700_v19  ;;  %v4072_v57 = vunpack.i.h.bf16 %v4070_v48  ;;  %v4071_v58 = vunpack.i.l.bf16 %v4070_v48 }
 0x340   : > { %v4085_v0 = vpop.permute.xlu0 %4084 }
 0x341   : > { %v4087_v25 = vunpack.i.h.bf16 %v4085_v0  ;;  %v4086_v2 = vunpack.i.l.bf16 %v4085_v0  ;;  %v2210_v0 = vsel %vm610_vm3, %v4066_v20, %v4067_v49  ;;  %v2211_v37 = vsel %vm610_vm3, %v4071_v58, %v4072_v57  ;;  %v2398_v49 = vld [vmem:[#allocation7 + $0x3a8] sm:$0xff] }
 0x342   : > { %3703 = vmatpush3.bf16.msra.mxu1 %v3700_v19  ;;  %v3756_v19 = vpack.c.bf16 %v2189_v40, %v2188_v50  ;;  %v2397_v40 = vld [vmem:[#allocation7 + $0x3a0] sm:$0xff]  ;;  %v2422_v20 = vsel %vm375_vm4, %v4076_v31, %v4077_v53 }
 0x343   : > { %3705 = vmatprep.subr.bf16.mxu1 %v3704_v16  ;;  %v1711_v59 = vsel %vm375_vm4, %v4086_v2, %v4087_v25  ;;  %v2193_v25 = vld [vmem:[#allocation7 + $0x2b8] sm:$0xff] }
 0x344   : > { %v4095_v55 = vpop.permute.xlu0 %4094  ;;  %2985 = vmatprep.mubr.f32.mxu0 %v1711_v59  ;;  %v3764_v2 = vpack.c.bf16 %v2193_v25, %v2192_v9  ;;  %v2195_v59 = vld [vmem:[#allocation7 + $0x2c8] sm:$0xff]  ;;  %v2403_v9 = vld [vmem:[#allocation7 + $0x3d0] sm:$0xff]  ;;  %v2404_v25 = vld [vmem:[#allocation7 + $0x3d8] sm:$0xff] }
 0x345   : > { %v4097_v35 = vunpack.i.h.bf16 %v4095_v55  ;;  %v4096_v15 = vunpack.i.l.bf16 %v4095_v55  ;;  %v2196_v55 = vld [vmem:[#allocation7 + $0x2d0] sm:$0xff] }
 0x346   : > { %3707 = vmatpush3.bf16.msra.mxu1 %v3704_v16  ;;  %v2191_v16 = vld [vmem:[#allocation7 + $0x2a8] sm:$0xff]  ;;  %v3772_v34 = vpack.c.bf16 %v2197_v33, %v2196_v55  ;;  %v2407_v55 = vld [vmem:[#allocation7 + $0x3f0] sm:$0xff]  ;;  %v2408_v33 = vld [vmem:[#allocation7 + $0x3f8] sm:$0xff] }
 0x347   : > { %v1712_v38 = vsel %vm375_vm4, %v4096_v15, %v4097_v35  ;;  %3709 = vmatprep.subr.bf16.mxu1 %v3708_v54  ;;  %v3760_v1 = vpack.c.bf16 %v2191_v16, %v2190_v21  ;;  %v2198_v35 = vld [vmem:[#allocation7 + $0x2e0] sm:$0xff]  ;;  %v2199_v15 = vld [vmem:[#allocation7 + $0x2e8] sm:$0xff]  ;;  %v2400_v21 = vld [vmem:[#allocation7 + $0x3b8] sm:$0xff] }
 0x348   : > { %2986 = vmatmul.mubr.f32.vlgmr.msra.gmra.mrb[6].mxu0 %v1712_v38  ;;  %v3776_v38 = vpack.c.bf16 %v2199_v15, %v2198_v35  ;;  %v2504_v35 = vld [vmem:[#allocation7 + $0x400] sm:$0xff]  ;;  %v2505_v15 = vld [vmem:[#allocation7 + $0x408] sm:$0xff] }
 0x34a   : > { %3711 = vmatpush3.bf16.msra.mxu1 %v3708_v54  ;;  %v3768_v54 = vpack.c.bf16 %v2195_v59, %v2194_v23  ;;  %v2406_v23 = vld [vmem:[#allocation7 + $0x3e8] sm:$0xff] }
 0x34b   : > { %3713 = vmatprep.subr.bf16.mxu1 %v3712_v13 }
 0x34e   : > { %3715 = vmatpush3.bf16.msra.mxu1 %v3712_v13  ;;  %v2200_v13 = vld [vmem:[#allocation7 + $0x2f0] sm:$0xff] }
 0x34f   : > { %3717 = vmatprep.subr.bf16.mxu1 %v3716_v46  ;;  %v3780_v43 = vpack.c.bf16 %v2201_v14, %v2200_v13  ;;  %v3848_v13 = vpack.c.bf16 %v2505_v15, %v2504_v35 }
 0x352   : > { %3719 = vmatpush3.bf16.msra.mxu1 %v3716_v46  ;;  %v2292_v46 = vld [vmem:[#allocation7 + $0x300] sm:$0xff] }
 0x353   : > { %3721 = vmatprep.subr.bf16.mxu1 %v3720_v56 }
 0x355   : > { %3091 = vmatmul.mubr.f32.vlgmr.msra.gmra.mrb[6].mxu1 %v4867_v41  ;;  %v3740_v41 = vpack.c.bf16 %v2085_v61, %v2084_v11  ;;  %v2302_v11 = vld [vmem:[#allocation7 + $0x350] sm:$0xff]  ;;  %v2303_v61 = vld [vmem:[#allocation7 + $0x358] sm:$0xff] }
 0x356   : > { %3723 = vmatpush3.bf16.msra.mxu1 %v3720_v56  ;;  %3125 = vmatprep.mubr.f32.mxu1 %v2104_v26  ;;  %v3784_v56 = vpack.c.bf16 %v2293_v47, %v2292_v46  ;;  %v2297_v26 = vld [vmem:[#allocation7 + $0x328] sm:$0xff]  ;;  %v2506_v46 = vld [vmem:[#allocation7 + $0x410] sm:$0xff]  ;;  %v2507_v47 = vld [vmem:[#allocation7 + $0x418] sm:$0xff] }
 0x357   : > { %3725 = vmatprep.subr.bf16.mxu1 %v3724_v36  ;;  %v3852_v57 = vpack.c.bf16 %v2507_v47, %v2506_v46 }
 0x35a   : > { %3727 = vmatpush3.bf16.msra.mxu1 %v3724_v36  ;;  %v3788_v36 = vpack.c.bf16 %v2295_v63, %v2294_v62  ;;  %v2508_v62 = vld [vmem:[#allocation7 + $0x420] sm:$0xff]  ;;  %v2509_v63 = vld [vmem:[#allocation7 + $0x428] sm:$0xff] }
 0x35b   : > { %3729 = vmatprep.subr.bf16.mxu1 %v3728_v42 }
 0x35e   : > { %3731 = vmatpush3.bf16.msra.mxu1 %v3728_v42  ;;  %v3792_v42 = vpack.c.bf16 %v2297_v26, %v2296_v5  ;;  %v2510_v5 = vld [vmem:[#allocation7 + $0x430] sm:$0xff]  ;;  %v2511_v26 = vld [vmem:[#allocation7 + $0x438] sm:$0xff] }
 0x35f   : > { %3733 = vmatprep.subr.bf16.mxu1 %v3732_v39 }
 0x362   : > { %3735 = vmatpush3.bf16.msra.mxu1 %v3732_v39  ;;  %v3796_v39 = vpack.c.bf16 %v2299_v7, %v2298_v6  ;;  %v2512_v6 = vld [vmem:[#allocation7 + $0x440] sm:$0xff]  ;;  %v2513_v7 = vld [vmem:[#allocation7 + $0x448] sm:$0xff] }
 0x363   : > { %3737 = vmatprep.subr.bf16.mxu1 %v3736_v51 }
 0x366   : > { %3739 = vmatpush3.bf16.msra.mxu1 %v3736_v51  ;;  %v3800_v51 = vpack.c.bf16 %v2301_v10, %v2300_v8  ;;  %v2514_v8 = vld [vmem:[#allocation7 + $0x450] sm:$0xff]  ;;  %v2515_v10 = vld [vmem:[#allocation7 + $0x458] sm:$0xff] }
 0x367   : > { %3741 = vmatprep.subr.bf16.mxu1 %v3740_v41 }
 0x36a   : > { %3743 = vmatpush3.bf16.msra.mxu1 %v3740_v41  ;;  %v3804_v41 = vpack.c.bf16 %v2303_v61, %v2302_v11  ;;  %v2516_v11 = vld [vmem:[#allocation7 + $0x460] sm:$0xff]  ;;  %v2517_v61 = vld [vmem:[#allocation7 + $0x468] sm:$0xff] }
 0x36b   : > { %3745 = vmatprep.subr.bf16.mxu1 %v3744_v44 }
 0x36e   : > { %3747 = vmatpush3.bf16.msra.mxu1 %v3744_v44  ;;  %v2306_v44 = vld [vmem:[#allocation7 + $0x370] sm:$0xff] }
 0x36f   : > { %3749 = vmatprep.subr.bf16.mxu1 %v3748_v32  ;;  %v3812_v4 = vpack.c.bf16 %v2307_v45, %v2306_v44 }
 0x372   : > { %3751 = vmatpush3.bf16.msra.mxu1 %v3748_v32  ;;  %v2393_v32 = vld [vmem:[#allocation7 + $0x380] sm:$0xff] }
 0x373   : > { %3753 = vmatprep.subr.bf16.mxu1 %v3752_v29  ;;  %v3816_v27 = vpack.c.bf16 %v2394_v52, %v2393_v32 }
 0x375   : > { %3126 = vmatmul.mubr.f32.vlgmr.msra.gmra.mrb[6].mxu1 %v2105_v28  ;;  %v2399_v28 = vld [vmem:[#allocation7 + $0x3b0] sm:$0xff] }
 0x376   : > { %3755 = vmatpush3.bf16.msra.mxu1 %v3752_v29  ;;  %3160 = vmatprep.mubr.f32.mxu1 %v2210_v0  ;;  %v2396_v29 = vld [vmem:[#allocation7 + $0x398] sm:$0xff]  ;;  %v3828_v16 = vpack.c.bf16 %v2400_v21, %v2399_v28  ;;  %v2401_v0 = vld [vmem:[#allocation7 + $0x3c0] sm:$0xff] }
 0x377   : > { %3757 = vmatprep.subr.bf16.mxu1 %v3756_v19  ;;  %v3820_v50 = vpack.c.bf16 %v2396_v29, %v2395_v24  ;;  %v2784_v29 = vld [vmem:[#allocation8] ss:$0 sm:$0xff] }
 0x37a   : > { %3759 = vmatpush3.bf16.msra.mxu1 %v3756_v19  ;;  %v3824_v19 = vpack.c.bf16 %v2398_v49, %v2397_v40 }
 0x37b   : > { %3761 = vmatprep.subr.bf16.mxu1 %v3760_v1 }
 0x37e   : > { %3763 = vmatpush3.bf16.msra.mxu1 %v3760_v1  ;;  %v3832_v1 = vpack.c.bf16 %v2402_v22, %v2401_v0 }
 0x37f   : > { %3765 = vmatprep.subr.bf16.mxu1 %v3764_v2 }
 0x382   : > { %3767 = vmatpush3.bf16.msra.mxu1 %v3764_v2  ;;  %v2405_v2 = vld [vmem:[#allocation7 + $0x3e0] sm:$0xff] }
 0x383   : > { %3769 = vmatprep.subr.bf16.mxu1 %v3768_v54  ;;  %v3840_v59 = vpack.c.bf16 %v2406_v23, %v2405_v2 }
 0x386   : > { %3771 = vmatpush3.bf16.msra.mxu1 %v3768_v54  ;;  %v4080_v54 = vpop.permute.xlu1 %4079 }
 0x387   : > { %3773 = vmatprep.subr.bf16.mxu1 %v3772_v34  ;;  %v4082_v14 = vunpack.i.h.bf16 %v4080_v54 }
 0x38a   : > { %3775 = vmatpush3.bf16.msra.mxu1 %v3772_v34  ;;  %v3844_v34 = vpack.c.bf16 %v2408_v33, %v2407_v55 }
 0x38b   : > { %3777 = vmatprep.subr.bf16.mxu1 %v3776_v38 }
 0x38e   : > { %3779 = vmatpush3.bf16.msra.mxu1 %v3776_v38  ;;  %v4090_v38 = vpop.permute.xlu1 %4089 }
 0x38f   : > { %3781 = vmatprep.subr.bf16.mxu1 %v3780_v43  ;;  %v4092_v48 = vunpack.i.h.bf16 %v4090_v38 }
 0x392   : > { %3783 = vmatpush3.bf16.msra.mxu1 %v3780_v43  ;;  %v4081_v43 = vunpack.i.l.bf16 %v4080_v54  ;;  %v4100_v44 = vpop.permute.xlu1 %4099 }
 0x393   : > { %3785 = vmatprep.subr.bf16.mxu1 %v3784_v56  ;;  %v4102_v45 = vunpack.i.h.bf16 %v4100_v44 }
 0x394   : > { %v2423_v58 = vsel %vm375_vm4, %v4081_v43, %v4082_v14 }
 0x395   : > { %3161 = vmatmul.mubr.f32.vlgmr.msra.gmra.mrb[6].mxu1 %v2211_v37  ;;  %v3856_v37 = vpack.c.bf16 %v2509_v63, %v2508_v62 }
 0x396   : > { %3787 = vmatpush3.bf16.msra.mxu1 %v3784_v56  ;;  %3195 = vmatprep.mubr.f32.mxu1 %v4853_v17  ;;  %v3808_v17 = vpack.c.bf16 %v2305_v12, %v2304_v60  ;;  %v4091_v56 = vunpack.i.l.bf16 %v4090_v38  ;;  %v2518_v60 = vld [vmem:[#allocation7 + $0x470] sm:$0xff]  ;;  %v2519_v12 = vld [vmem:[#allocation7 + $0x478] sm:$0xff] }
 0x397   : > { %3789 = vmatprep.subr.bf16.mxu1 %v3788_v36 }
 0x39a   : > { %3791 = vmatpush3.bf16.msra.mxu1 %v3788_v36  ;;  %v2528_v36 = vsel %vm610_vm3, %v4091_v56, %v4092_v48 }
 0x39b   : > { %3793 = vmatprep.subr.bf16.mxu1 %v3792_v42 }
 0x39e   : > { %3795 = vmatpush3.bf16.msra.mxu1 %v3792_v42  ;;  %v3860_v42 = vpack.c.bf16 %v2511_v26, %v2510_v5 }
 0x39f   : > { %3797 = vmatprep.subr.bf16.mxu1 %v3796_v39 }
 0x3a2   : > { %3799 = vmatpush3.bf16.msra.mxu1 %v3796_v39  ;;  %v3864_v39 = vpack.c.bf16 %v2513_v7, %v2512_v6 }
 0x3a3   : > { %3801 = vmatprep.subr.bf16.mxu1 %v3800_v51 }
 0x3a6   : > { %3803 = vmatpush3.bf16.msra.mxu1 %v3800_v51  ;;  %v3868_v51 = vpack.c.bf16 %v2515_v10, %v2514_v8 }
 0x3a7   : > { %3805 = vmatprep.subr.bf16.mxu1 %v3804_v41 }
 0x3aa   : > { %3807 = vmatpush3.bf16.msra.mxu1 %v3804_v41  ;;  %v3872_v41 = vpack.c.bf16 %v2517_v61, %v2516_v11 }
 0x3ab   : > { %3809 = vmatprep.subr.bf16.mxu1 %v3808_v17 }
 0x3ae   : > { %3811 = vmatpush3.bf16.msra.mxu1 %v3808_v17  ;;  %v3876_v17 = vpack.c.bf16 %v2519_v12, %v2518_v60 }
 0x3af   : > { %3813 = vmatprep.subr.bf16.mxu1 %v3812_v4 }
 0x3b2   : > { %3815 = vmatpush3.bf16.msra.mxu1 %v3812_v4  ;;  %v4101_v4 = vunpack.i.l.bf16 %v4100_v44 }
 0x3b3   : > { %3817 = vmatprep.subr.bf16.mxu1 %v3816_v27 }
 0x3b4   : > { %v2529_v32 = vsel %vm610_vm3, %v4101_v4, %v4102_v45 }
 0x3b5   : > { %3196 = vmatmul.mubr.f32.vlgmr.msra.gmra.mrb[6].mxu1 %v4870_v18  ;;  %v3836_v18 = vpack.c.bf16 %v2404_v25, %v2403_v9 }
 0x3b6   : > { %3819 = vmatpush3.bf16.msra.mxu1 %v3816_v27  ;;  %3230 = vmatprep.mubr.f32.mxu1 %v2422_v20 }
 0x3b7   : > { %3821 = vmatprep.subr.bf16.mxu1 %v3820_v50 }
 0x3ba   : > { %3823 = vmatpush3.bf16.msra.mxu1 %v3820_v50 }
 0x3bb   : > { %3825 = vmatprep.subr.bf16.mxu1 %v3824_v19 }
 0x3be   : > { %3827 = vmatpush3.bf16.msra.mxu1 %v3824_v19 }
 0x3bf   : > { %3829 = vmatprep.subr.bf16.mxu1 %v3828_v16 }
 0x3c2   : > { %3831 = vmatpush3.bf16.msra.mxu1 %v3828_v16 }
 0x3c3   : > { %3833 = vmatprep.subr.bf16.mxu1 %v3832_v1 }
 0x3c6   : > { %3835 = vmatpush3.bf16.msra.mxu1 %v3832_v1 }
 0x3c7   : > { %3837 = vmatprep.subr.bf16.mxu1 %v3836_v18 }
 0x3ca   : > { %3839 = vmatpush3.bf16.msra.mxu1 %v3836_v18 }
 0x3cb   : > { %3841 = vmatprep.subr.bf16.mxu1 %v3840_v59 }
 0x3ce   : > { %3843 = vmatpush3.bf16.msra.mxu1 %v3840_v59 }
 0x3cf   : > { %3845 = vmatprep.subr.bf16.mxu1 %v3844_v34 }
 0x3d2   : > { %3847 = vmatpush3.bf16.msra.mxu1 %v3844_v34 }
 0x3d3   : > { %3849 = vmatprep.subr.bf16.mxu1 %v3848_v13 }
 0x3d5   : > { %3231 = vmatmul.mubr.f32.vlgmr.msra.gmra.mrb[6].mxu1 %v2423_v58 }
 0x3d6   : > { %3851 = vmatpush3.bf16.msra.mxu1 %v3848_v13  ;;  %3265 = vmatprep.mubr.f32.mxu1 %v2528_v36 }
 0x3d7   : > { %3853 = vmatprep.subr.bf16.mxu1 %v3852_v57 }
 0x3da   : > { %3855 = vmatpush3.bf16.msra.mxu1 %v3852_v57 }
 0x3db   : > { %3857 = vmatprep.subr.bf16.mxu1 %v3856_v37 }
 0x3de   : > { %3859 = vmatpush3.bf16.msra.mxu1 %v3856_v37 }
 0x3df   : > { %3861 = vmatprep.subr.bf16.mxu1 %v3860_v42 }
 0x3e2   : > { %3863 = vmatpush3.bf16.msra.mxu1 %v3860_v42 }
 0x3e3   : > { %3865 = vmatprep.subr.bf16.mxu1 %v3864_v39 }
 0x3e6   : > { %3867 = vmatpush3.bf16.msra.mxu1 %v3864_v39 }
 0x3e7   : > { %3869 = vmatprep.subr.bf16.mxu1 %v3868_v51 }
 0x3ea   : > { %3871 = vmatpush3.bf16.msra.mxu1 %v3868_v51 }
 0x3eb   : > { %3873 = vmatprep.subr.bf16.mxu1 %v3872_v41 }
 0x3ee   : > { %3875 = vmatpush3.bf16.msra.mxu1 %v3872_v41 }
 0x3ef   : > { %3877 = vmatprep.subr.bf16.mxu1 %v3876_v17 }
 0x3f2   : > { %3879 = vmatpush3.bf16.msra.mxu1 %v3876_v17 }
 0x3f5   : > { %3266 = vmatmul.mubr.f32.vlgmr.msra.gmra.mrb[6].mxu1 %v2529_v32 }
 0x41b   : > { %v2987_v52 = vpop.f32.mrb[6].mxu0 }
 0x41c   : > { %v1781_v27 = vpop.f32.mrb[7].mxu0 }
 0x4c8   : > { %v3267_v24 = vpop.f32.mrb[6].mxu1 }
 0x4c9   : > { %v3886_v53 = vadd.f32 %v3267_v24, %v2987_v52  ;;  %v2598_v31 = vpop.f32.mrb[7].mxu1 }
 0x4ca   : > { %v3887_v50 = vadd.f32 %v2598_v31, %v1781_v27 }
 0x4cb   : > { %v2617_v40 = vadd.f32 %v3886_v53, %v2784_v29 }
 0x4cc   : > { %v2616_v49 = vadd.f32 %v3887_v50, %v2784_v29 }
 0x4cd   : > { %v2619_v20 = vadd.f32 %v2617_v40, %v4771_v30 }
 0x4ce   : > { %v2618_v19 = vadd.f32 %v2616_v49, %v4763_v3 }
 0x4cf   : > { %v2621_v28 = vmax.f32 %v2619_v20, 0.0 }
 0x4d0   : > { %v2620_v21 = vmax.f32 %v2618_v19, 0.0 }
 0x4d1   : > { %2623 = vst [vmem:[%s272_s25 + $0x8] sm:$0xff] %v2621_v28 }
 0x4d2   : > { %2622 = vst [vmem:[%s272_s25] sm:$0xff] %v2620_v21 }
 0x4d3   : > { %4228 = shalt.err (!%p4225_p1)
}
 0x4d4   : > { %s4229_s10 = scalar_lea.hbm %s4926_s9, 256  ;;  %s4233_s14 = scalar_lea.hbm %s4974_s5, 512 }
 0x4d5   : > { %p4230_p0 = scmp.ne.s32.totalorder %s4926_s9, %s4229_s10  ;;  %p4234_p9 = scmp.lt.u32.totalorder %s4926_s9, %s4974_s5 }
 0x4d6   : > { %p4235_p12 = scmp.lt.u32.totalorder %s4233_s14, %s4229_s10  ;;  %p4237_p2 = scmp.lt.u32.totalorder %s4229_s10, %s4926_s9 }
 0x4d7   : > { %p4231_p6 = pnand %p4230_p0, %p5000_p3 }
 0x4d8   : > { %p4236_p10 = por %p4235_p12, %p4234_p9 }
 0x4d9   : > { %p4232_p5 = pneg %p4231_p6 }
 0x4da   : > { %p4238_p4 = por %p4237_p2, %p4236_p10 }
 0x4dc   : > { %p4239_p7 = pnand %p4238_p4, %p4232_p5 }
 0x4de   : > { %4242 = shalt.err (!%p4239_p7)
}
 0x4df   : > { %s4302_s17 = smov 128   ;;  %s4303_s25 = smov 8  }
 0x4e0   : > { %3961 = dma.vmem_to_hbm [thread:$0]  (%p5000_p3), %s4921_s26, 256, %s4926_s9, %s4928_s6, %s4302_s17, %s4302_s17, %s4303_s25  }
 0x4e1 PF: > { %p3988_p8 = scmp.ge.s32.totalorder %s4289_s21, 2  ;;  %s2653_s7 = sand.u32 1, %s4277_s18  }
 0x4e2   : > { %p5001_p11 = scmp.ne.s32.totalorder %s4980_s29, 0  ;;  %s2654_s11 = scalar_lea.sflag [#allocation4], %s2653_s7 }
 0x4e4   : > { %p3977_p13 = pnand %p3988_p8, %p5001_p11 }
 0x4e6   : > { %4272 = dma.done.wait (!%p3977_p13), %s2654_s11, 256  }
 0x4e7   : > { %4274 = vsyncadd (!%p3977_p13), %s2654_s11, 4294967040  ;;  %p18_p1 = scmp.ge.s32.totalorder %s4359_s24, 4   ;;  %s5002_s18 = smov %s4281_s19 }
 0x4e8   : > { %s5003_s19 = smov %s4285_s20  ;;  %s5004_s20 = smov %s4370_s27 }
 0x4e9   : > { %s5005_s21 = smov %s4359_s24  ;;  %20 = sbr.rel (!%p18_p1) target bundleno = 8 (0x8), region = 108 }
 0x4f0   :  { %2659 = vsyncpa [#allocation3], 1 }
 0x4f1   :  { %2661 = vsyncpa [#allocation3 + $0x1], 1 }
 0x4f2   :  { %2662 = vsyncpa [#allocation6], 1 }
 0x4f3   :  { %2663 = vsyncpa [#allocation9], 1 }
 0x4f4   :  { %2664 = vsyncpa [#allocation4], 1 }
 0x4f5   :  { %2666 = vsyncpa [#allocation4 + $0x1], 1 }

</bundles_post_ra>
